<compile_context>
chip_gen: v5e
topology: v5e:2x2
jax: 0.10.0
libtpu: 0.0.40
codegen_flags: <defaults>
</compile_context>

<pallas_src>
import jax
import jax.numpy as jnp
from jax.experimental import pallas as pl
from jax.experimental.pallas import tpu as pltpu  # noqa: F401  (kept for scale-up knobs)

# ----------------------- tiny BERT config (synthetic) -----------------------
VOCAB = 100
HIDDEN = 32
LAYERS = 2
HEADS = 2
HEAD_DIM = HIDDEN // HEADS
INTER = 64
MAX_POS = 16
TYPE_VOCAB = 2
NUM_LABELS = 2
LN_EPS = 1e-12

LANE = 128


def _round_up(n, m):
    return ((n + m - 1) // m) * m


HP = _round_up(HIDDEN, LANE)       # lane-padded hidden       (128)
IP = _round_up(INTER, LANE)        # lane-padded intermediate (128)
LP = _round_up(NUM_LABELS, LANE)   # lane-padded num_labels   (128)


# --------------------------- in-kernel helpers -------------------------------
def _masked_ln(x, g, b, valid, true_dim):
    """LayerNorm over the zero-padded lane axis; stats use only `true_dim` lanes.
    gamma/beta are zero-padded, so output padding remains exactly zero."""
    inv_n = 1.0 / true_dim
    mu = jnp.sum(x, axis=-1, keepdims=True) * inv_n          # padded lanes are zero
    xc = (x - mu) * valid
    var = jnp.sum(xc * xc, axis=-1, keepdims=True) * inv_n
    return xc * jax.lax.rsqrt(var + LN_EPS) * g + b


# ------------------------------ fused kernel ---------------------------------
def _make_bert_kernel(B, S):
    """Whole-model kernel: emb-LN -> LAYERS x encoder -> pooler -> classifier."""
    scale = 1.0 / (HEAD_DIM ** 0.5)

    def kernel(emb_ref, bias_ref, eg_ref, eb_ref,
               wqkv_ref, bqkv_ref, wo_ref, bo_ref, ln1g_ref, ln1b_ref,
               w1_ref, fb1_ref, w2_ref, fb2_ref, ln2g_ref, ln2b_ref,
               wp_ref, bp_ref, wc_ref, bc_ref, o_ref):
        lane = jax.lax.broadcasted_iota(jnp.int32, (1, HP), 1)
        valid = (lane < HIDDEN).astype(jnp.float32)
        head_masks = [((lane >= hd * HEAD_DIM)
                       & (lane < (hd + 1) * HEAD_DIM)).astype(jnp.float32)
                      for hd in range(HEADS)]
        bias_all = bias_ref[...]                              # [B, 128] lane-dense

        # ---- embedding LayerNorm over the full (B*S, HP) slab ----
        h = _masked_ln(emb_ref[...].astype(jnp.float32),
                       eg_ref[...], eb_ref[...], valid, HIDDEN)

        # ---- encoder layers: weights resident in VMEM, unrolled static loop ----
        for l in range(LAYERS):
            # fused Q|K|V projection on the whole batch (bf16 MXU, f32 accum)
            qkv = jnp.dot(h.astype(jnp.bfloat16), wqkv_ref[l],
                          preferred_element_type=jnp.float32) + bqkv_ref[l]
            q, k, v = qkv[:, :HP], qkv[:, HP:2 * HP], qkv[:, 2 * HP:]

            # per-sequence attention on sublane-aligned static row slices;
            # heads via lane masks over the full 128-lane contraction.
            ctx_rows = []
            for b in range(B):
                r0 = b * S
                ks = k[r0:r0 + S, :]                          # [S, HP]
                bias_b = bias_all[b:b + 1, :S]                # [1, S] additive bias
                ctx_b = None
                for hm in head_masks:
                    qs = q[r0:r0 + S, :] * hm                 # head lanes only
                    vs = v[r0:r0 + S, :] * hm
                    s = jax.lax.dot_general(qs, ks, (((1,), (1,)), ((), ())),
                                            preferred_element_type=jnp.float32)
                    s = s * scale + bias_b
                    s = s - jnp.max(s, axis=-1, keepdims=True)
                    p = jnp.exp(s)
                    p = p / jnp.sum(p, axis=-1, keepdims=True)        # exact softmax
                    c = jnp.dot(p, vs, preferred_element_type=jnp.float32)
                    ctx_b = c if ctx_b is None else ctx_b + c         # lane "concat"
                ctx_rows.append(ctx_b)
            ctx = jnp.concatenate(ctx_rows, axis=0) if B > 1 else ctx_rows[0]

            # output projection + residual + LN1
            attn = jnp.dot(ctx.astype(jnp.bfloat16), wo_ref[l],
                           preferred_element_type=jnp.float32) + bo_ref[l]
            h1 = _masked_ln(h + attn, ln1g_ref[l], ln1b_ref[l], valid, HIDDEN)

            # FFN (GELU) + residual + LN2
            f = jnp.dot(h1.astype(jnp.bfloat16), w1_ref[l],
                        preferred_element_type=jnp.float32) + fb1_ref[l]
            # TODO(synk): HF BERT default is exact erf-GELU; tanh approximation used here.
            f = 0.5 * f * (1.0 + jnp.tanh(0.7978845608028654
                                          * (f + 0.044715 * f * f * f)))
            f = jnp.dot(f.astype(jnp.bfloat16), w2_ref[l],
                        preferred_element_type=jnp.float32) + fb2_ref[l]
            h = _masked_ln(h1 + f, ln2g_ref[l], ln2b_ref[l], valid, HIDDEN)

        # ---- pooler (tanh on CLS token) + classifier ----
        cls_rows = [h[b * S:b * S + 1, :] for b in range(B)]
        cls = jnp.concatenate(cls_rows, axis=0) if B > 1 else cls_rows[0]
        pooled = jnp.tanh(jnp.dot(cls.astype(jnp.bfloat16), wp_ref[...],
                                  preferred_element_type=jnp.float32) + bp_ref[...])
        o_ref[...] = (jnp.dot(pooled.astype(jnp.bfloat16), wc_ref[...],
                              preferred_element_type=jnp.float32) + bc_ref[...]
                      ).astype(o_ref.dtype)

    return kernel


# ------------------------- deterministic param init --------------------------
def init_params(key):
    keys = iter(jax.random.split(key, 64))

    def w(shape, scale=0.02):
        return (scale * jax.random.normal(next(keys), shape)).astype(jnp.float32)

    params = {
        "word_emb": w((VOCAB, HIDDEN)),
        "pos_emb": w((MAX_POS, HIDDEN)),
        "type_emb": w((TYPE_VOCAB, HIDDEN)),
        "emb_ln_g": jnp.ones((HIDDEN,), jnp.float32),
        "emb_ln_b": jnp.zeros((HIDDEN,), jnp.float32),
        "layers": [],
        "wp": w((HIDDEN, HIDDEN)),
        "bp": jnp.zeros((HIDDEN,), jnp.float32),
        "wc": w((HIDDEN, NUM_LABELS)),
        "bc": jnp.zeros((NUM_LABELS,), jnp.float32),
    }
    for _ in range(LAYERS):
        params["layers"].append({
            "wq": w((HIDDEN, HIDDEN)), "bq": jnp.zeros((HIDDEN,), jnp.float32),
            "wk": w((HIDDEN, HIDDEN)), "bk": jnp.zeros((HIDDEN,), jnp.float32),
            "wv": w((HIDDEN, HIDDEN)), "bv": jnp.zeros((HIDDEN,), jnp.float32),
            "wo": w((HIDDEN, HIDDEN)), "bo": jnp.zeros((HIDDEN,), jnp.float32),
            "ln1_g": jnp.ones((HIDDEN,), jnp.float32),
            "ln1_b": jnp.zeros((HIDDEN,), jnp.float32),
            "w1": w((HIDDEN, INTER)), "b1": jnp.zeros((INTER,), jnp.float32),
            "w2": w((INTER, HIDDEN)), "b2": jnp.zeros((HIDDEN,), jnp.float32),
            "ln2_g": jnp.ones((HIDDEN,), jnp.float32),
            "ln2_b": jnp.zeros((HIDDEN,), jnp.float32),
        })
    return params


# ------------ one-time lane padding / QKV fusion / layer stacking ------------
def _pad2(m, rows, cols):
    return jnp.zeros((rows, cols), jnp.float32).at[: m.shape[0], : m.shape[1]].set(m)


def _pad_row(v, cols):
    return jnp.zeros((1, cols), jnp.float32).at[0, : v.shape[0]].set(v)


def pad_params(p):
    def stack(fn):
        return jnp.stack([fn(lw) for lw in p["layers"]], axis=0)

    def fused_wqkv(lw):
        w = jnp.zeros((HP, 3 * HP), jnp.float32)
        w = w.at[:HIDDEN, 0:HIDDEN].set(lw["wq"])
        w = w.at[:HIDDEN, HP:HP + HIDDEN].set(lw["wk"])
        w = w.at[:HIDDEN, 2 * HP:2 * HP + HIDDEN].set(lw["wv"])
        return w

    def fused_bqkv(lw):
        b = jnp.zeros((1, 3 * HP), jnp.float32)
        b = b.at[0, 0:HIDDEN].set(lw["bq"])
        b = b.at[0, HP:HP + HIDDEN].set(lw["bk"])
        b = b.at[0, 2 * HP:2 * HP + HIDDEN].set(lw["bv"])
        return b

    bf16 = lambda x: x.astype(jnp.bfloat16)   # MXU operands only; math stays f32
    return {
        "word_emb": _pad2(p["word_emb"], VOCAB, HP),
        "pos_emb": _pad2(p["pos_emb"], MAX_POS, HP),
        "type_emb": _pad2(p["type_emb"], TYPE_VOCAB, HP),
        "emb_ln_g": _pad_row(p["emb_ln_g"], HP),
        "emb_ln_b": _pad_row(p["emb_ln_b"], HP),
        "wqkv": bf16(stack(fused_wqkv)),                      # [L, HP, 3HP]
        "bqkv": stack(fused_bqkv),                            # [L, 1, 3HP]
        "wo": bf16(stack(lambda lw: _pad2(lw["wo"], HP, HP))),
        "bo": stack(lambda lw: _pad_row(lw["bo"], HP)),
        "ln1_g": stack(lambda lw: _pad_row(lw["ln1_g"], HP)),
        "ln1_b": stack(lambda lw: _pad_row(lw["ln1_b"], HP)),
        "w1": bf16(stack(lambda lw: _pad2(lw["w1"], HP, IP))),
        "b1": stack(lambda lw: _pad_row(lw["b1"], IP)),
        "w2": bf16(stack(lambda lw: _pad2(lw["w2"], IP, HP))),
        "b2": stack(lambda lw: _pad_row(lw["b2"], HP)),
        "ln2_g": stack(lambda lw: _pad_row(lw["ln2_g"], HP)),
        "ln2_b": stack(lambda lw: _pad_row(lw["ln2_b"], HP)),
        "wp": bf16(_pad2(p["wp"], HP, HP)), "bp": _pad_row(p["bp"], HP),
        "wc": bf16(_pad2(p["wc"], HP, LP)), "bc": _pad_row(p["bc"], LP),
    }


# ------------------------------ forward pass ----------------------------------
def bert_forward(pp, input_ids, token_type_ids, attention_mask):
    B, S = input_ids.shape
    BS = B * S

    # embeddings (gather + add is plain-JAX glue; tables are lane-padded to 128)
    emb = (jnp.take(pp["word_emb"], input_ids, axis=0)
           + pp["pos_emb"][None, :S, :]
           + jnp.take(pp["type_emb"], token_type_ids, axis=0)).reshape(BS, HP)

    # lane-dense additive attention bias (HF extended-attention-mask semantics)
    bias = jnp.full((B, LANE), -1e9, jnp.float32)
    bias = bias.at[:, :S].set((1.0 - attention_mask.astype(jnp.float32)) * -1e9)

    args = (emb, bias, pp["emb_ln_g"], pp["emb_ln_b"],
            pp["wqkv"], pp["bqkv"], pp["wo"], pp["bo"], pp["ln1_g"], pp["ln1_b"],
            pp["w1"], pp["b1"], pp["w2"], pp["b2"], pp["ln2_g"], pp["ln2_b"],
            pp["wp"], pp["bp"], pp["wc"], pp["bc"])

    # cost estimate over the padded shapes the MXU actually executes
    flops = (LAYERS * (2 * BS * HP * 3 * HP            # qkv projection
                       + HEADS * B * 4 * S * S * HP    # qk^T and p@v (128-lane contraction)
                       + 2 * BS * HP * HP              # output projection
                       + 4 * BS * HP * IP)             # FFN
             + 2 * B * HP * HP + 2 * B * HP * LP)      # pooler + classifier
    transcendentals = LAYERS * (HEADS * B * S * S + BS * IP + 2 * BS) + BS + B * HP
    bytes_accessed = int(sum(a.size * a.dtype.itemsize for a in args) + B * LP * 4)

    # Single fused launch: everything (weights + activations, <1 MiB) resides
    # in VMEM for the whole forward.  At real BERT-base scale, add a "parallel"
    # row-tile grid axis (v7x dual TCs) and pl.Buffered(1) on weight specs.
    logits_pad = pl.pallas_call(
        _make_bert_kernel(B, S),
        out_shape=jax.ShapeDtypeStruct((B, LP), jnp.float32),
        cost_estimate=pl.CostEstimate(flops=flops, transcendentals=transcendentals,
                                      bytes_accessed=bytes_accessed),
    )(*args)
    return logits_pad[:, :NUM_LABELS]                  # slice real labels out of pad


class BertMAPPallas:
    """Mirror of BertMAP.forward: takes a dict of tensors, drops 'idx', returns logits."""

    def __init__(self, params):
        self.params = pad_params(params)               # one-time padding / fusion / stacking
        self.num_labels = NUM_LABELS
        self._forward = jax.jit(bert_forward)

    def forward(self, x):
        if isinstance(x, dict):
            x = dict(x)
            x.pop("idx", None)
            return self._forward(self.params,
                                 x["input_ids"],
                                 x["token_type_ids"],
                                 x["attention_mask"])


# ---------------------------------- main --------------------------------------
if __name__ == "__main__":
    key = jax.random.PRNGKey(0)
    k_param, k_ids = jax.random.split(key)

    B, S = 2, 8
    params = init_params(k_param)

    input_ids = jax.random.randint(k_ids, (B, S), 0, VOCAB, dtype=jnp.int32)
    token_type_ids = jnp.zeros((B, S), jnp.int32)
    attention_mask = jnp.ones((B, S), jnp.int32).at[1, S - 2:].set(0)  # pad last 2 of ex 1

    batch = {
        "idx": jnp.arange(B, dtype=jnp.int32),   # dropped, as in BertMAP.forward
        "input_ids": input_ids,
        "token_type_ids": token_type_ids,
        "attention_mask": attention_mask,
    }

    model = BertMAPPallas(params)
    logits = model.forward(batch)
    jax.block_until_ready(logits)

    assert logits.shape == (B, NUM_LABELS)
    assert bool(jnp.all(jnp.isfinite(logits)))
    print("KERNEL_OK")
</pallas_src>

<mosaic_0001>
module attributes {stable_mosaic.version = 11 : i64} {
  func.func @kernel(%arg0: memref<16x128xf32, #tpu.memory_space<vmem>>, %arg1: memref<2x128xf32, #tpu.memory_space<vmem>>, %arg2: memref<1x128xf32, #tpu.memory_space<vmem>>, %arg3: memref<1x128xf32, #tpu.memory_space<vmem>>, %arg4: memref<2x128x384xbf16, #tpu.memory_space<vmem>>, %arg5: memref<2x1x384xf32, #tpu.memory_space<vmem>>, %arg6: memref<2x128x128xbf16, #tpu.memory_space<vmem>>, %arg7: memref<2x1x128xf32, #tpu.memory_space<vmem>>, %arg8: memref<2x1x128xf32, #tpu.memory_space<vmem>>, %arg9: memref<2x1x128xf32, #tpu.memory_space<vmem>>, %arg10: memref<2x128x128xbf16, #tpu.memory_space<vmem>>, %arg11: memref<2x1x128xf32, #tpu.memory_space<vmem>>, %arg12: memref<2x128x128xbf16, #tpu.memory_space<vmem>>, %arg13: memref<2x1x128xf32, #tpu.memory_space<vmem>>, %arg14: memref<2x1x128xf32, #tpu.memory_space<vmem>>, %arg15: memref<2x1x128xf32, #tpu.memory_space<vmem>>, %arg16: memref<128x128xbf16, #tpu.memory_space<vmem>>, %arg17: memref<1x128xf32, #tpu.memory_space<vmem>>, %arg18: memref<128x128xbf16, #tpu.memory_space<vmem>>, %arg19: memref<1x128xf32, #tpu.memory_space<vmem>>, %arg20: memref<2x128xf32, #tpu.memory_space<vmem>>) attributes {dimension_semantics = [], scalar_prefetch = 0 : i64, scratch_operands = 0 : i64, tpu.core_type = #tpu.core_type<tc>} {
    %0 = tpu.iota {dimensions = array<i32: 1>} : vector<1x128xi32>
    %c32_i32 = arith.constant 32 : i32
    %1 = vector.broadcast %c32_i32 : i32 to vector<1x128xi32>
    %2 = arith.cmpi slt, %0, %1 : vector<1x128xi32>
    %3 = arith.extui %2 : vector<1x128xi1> to vector<1x128xi32>
    %4 = arith.sitofp %3 : vector<1x128xi32> to vector<1x128xf32>
    %c0_i32 = arith.constant 0 : i32
    %5 = vector.broadcast %c0_i32 : i32 to vector<1x128xi32>
    %6 = arith.cmpi sge, %0, %5 : vector<1x128xi32>
    %c16_i32 = arith.constant 16 : i32
    %7 = vector.broadcast %c16_i32 : i32 to vector<1x128xi32>
    %8 = arith.cmpi slt, %0, %7 : vector<1x128xi32>
    %9 = arith.andi %6, %8 : vector<1x128xi1>
    %10 = arith.extui %9 : vector<1x128xi1> to vector<1x128xi32>
    %11 = arith.sitofp %10 : vector<1x128xi32> to vector<1x128xf32>
    %c16_i32_0 = arith.constant 16 : i32
    %12 = vector.broadcast %c16_i32_0 : i32 to vector<1x128xi32>
    %13 = arith.cmpi sge, %0, %12 : vector<1x128xi32>
    %c32_i32_1 = arith.constant 32 : i32
    %14 = vector.broadcast %c32_i32_1 : i32 to vector<1x128xi32>
    %15 = arith.cmpi slt, %0, %14 : vector<1x128xi32>
    %16 = arith.andi %13, %15 : vector<1x128xi1>
    %17 = arith.extui %16 : vector<1x128xi1> to vector<1x128xi32>
    %18 = arith.sitofp %17 : vector<1x128xi32> to vector<1x128xf32>
    %c0 = arith.constant 0 : index
    %c0_2 = arith.constant 0 : index
    %19 = vector.load %arg1[%c0, %c0_2] : memref<2x128xf32, #tpu.memory_space<vmem>>, vector<2x128xf32>
    %c0_3 = arith.constant 0 : index
    %c0_4 = arith.constant 0 : index
    %20 = vector.load %arg0[%c0_3, %c0_4] : memref<16x128xf32, #tpu.memory_space<vmem>>, vector<16x128xf32>
    %c0_5 = arith.constant 0 : index
    %c0_6 = arith.constant 0 : index
    %21 = vector.load %arg2[%c0_5, %c0_6] : memref<1x128xf32, #tpu.memory_space<vmem>>, vector<1x128xf32>
    %c0_7 = arith.constant 0 : index
    %c0_8 = arith.constant 0 : index
    %22 = vector.load %arg3[%c0_7, %c0_8] : memref<1x128xf32, #tpu.memory_space<vmem>>, vector<1x128xf32>
    %cst = arith.constant dense<0.000000e+00> : vector<16xf32>
    %23 = vector.multi_reduction <add>, %20, %cst [1] : vector<16x128xf32> to vector<16xf32>
    %24 = vector.shape_cast %23 : vector<16xf32> to vector<16x1xf32>
    %cst_9 = arith.constant 3.125000e-02 : f32
    %25 = vector.broadcast %cst_9 : f32 to vector<16x1xf32>
    %26 = arith.mulf %24, %25 : vector<16x1xf32>
    %27 = vector.broadcast %26 : vector<16x1xf32> to vector<16x128xf32>
    %28 = arith.subf %20, %27 : vector<16x128xf32>
    %29 = vector.broadcast %4 : vector<1x128xf32> to vector<16x128xf32>
    %30 = arith.mulf %28, %29 : vector<16x128xf32>
    %31 = arith.mulf %30, %30 : vector<16x128xf32>
    %cst_10 = arith.constant dense<0.000000e+00> : vector<16xf32>
    %32 = vector.multi_reduction <add>, %31, %cst_10 [1] : vector<16x128xf32> to vector<16xf32>
    %33 = vector.shape_cast %32 : vector<16xf32> to vector<16x1xf32>
    %cst_11 = arith.constant 3.125000e-02 : f32
    %34 = vector.broadcast %cst_11 : f32 to vector<16x1xf32>
    %35 = arith.mulf %33, %34 : vector<16x1xf32>
    %cst_12 = arith.constant 9.99999996E-13 : f32
    %36 = vector.broadcast %cst_12 : f32 to vector<16x1xf32>
    %37 = arith.addf %35, %36 : vector<16x1xf32>
    %38 = math.rsqrt %37 : vector<16x1xf32>
    %39 = vector.broadcast %38 : vector<16x1xf32> to vector<16x128xf32>
    %40 = arith.mulf %30, %39 : vector<16x128xf32>
    %41 = vector.broadcast %21 : vector<1x128xf32> to vector<16x128xf32>
    %42 = arith.mulf %40, %41 : vector<16x128xf32>
    %43 = vector.broadcast %22 : vector<1x128xf32> to vector<16x128xf32>
    %44 = arith.addf %42, %43 : vector<16x128xf32>
    %45 = arith.truncf %44 : vector<16x128xf32> to vector<16x128xbf16>
    %c0_13 = arith.constant 0 : index
    %c0_14 = arith.constant 0 : index
    %c0_15 = arith.constant 0 : index
    %46 = vector.load %arg4[%c0_13, %c0_14, %c0_15] : memref<2x128x384xbf16, #tpu.memory_space<vmem>>, vector<1x128x384xbf16>
    %47 = vector.shape_cast %46 : vector<1x128x384xbf16> to vector<128x384xbf16>
    %cst_16 = arith.constant dense<0.000000e+00> : vector<16x384xf32>
    %48 = tpu.matmul %45, %47, %cst_16 {dimension_numbers = #tpu.dot_dimension_numbers<[1], [0], [0], [1], [0, 0, 1, 1], [], []>} : vector<16x128xbf16>, vector<128x384xbf16>, vector<16x384xf32> -> vector<16x384xf32>
    %c0_17 = arith.constant 0 : index
    %c0_18 = arith.constant 0 : index
    %c0_19 = arith.constant 0 : index
    %49 = vector.load %arg5[%c0_17, %c0_18, %c0_19] : memref<2x1x384xf32, #tpu.memory_space<vmem>>, vector<1x1x384xf32>
    %50 = vector.shape_cast %49 : vector<1x1x384xf32> to vector<1x384xf32>
    %51 = vector.broadcast %50 : vector<1x384xf32> to vector<16x384xf32>
    %52 = arith.addf %48, %51 : vector<16x384xf32>
    %53 = vector.extract_strided_slice %52 {offsets = [0, 0], sizes = [16, 128], strides = [1, 1]} : vector<16x384xf32> to vector<16x128xf32>
    %54 = vector.extract_strided_slice %52 {offsets = [0, 128], sizes = [16, 128], strides = [1, 1]} : vector<16x384xf32> to vector<16x128xf32>
    %55 = vector.extract_strided_slice %52 {offsets = [0, 256], sizes = [16, 128], strides = [1, 1]} : vector<16x384xf32> to vector<16x128xf32>
    %56 = vector.extract_strided_slice %54 {offsets = [0, 0], sizes = [8, 128], strides = [1, 1]} : vector<16x128xf32> to vector<8x128xf32>
    %57 = vector.extract_strided_slice %19 {offsets = [0, 0], sizes = [1, 8], strides = [1, 1]} : vector<2x128xf32> to vector<1x8xf32>
    %58 = vector.extract_strided_slice %53 {offsets = [0, 0], sizes = [8, 128], strides = [1, 1]} : vector<16x128xf32> to vector<8x128xf32>
    %59 = vector.broadcast %11 : vector<1x128xf32> to vector<8x128xf32>
    %60 = arith.mulf %58, %59 : vector<8x128xf32>
    %61 = vector.extract_strided_slice %55 {offsets = [0, 0], sizes = [8, 128], strides = [1, 1]} : vector<16x128xf32> to vector<8x128xf32>
    %62 = vector.broadcast %11 : vector<1x128xf32> to vector<8x128xf32>
    %63 = arith.mulf %61, %62 : vector<8x128xf32>
    %cst_20 = arith.constant dense<0.000000e+00> : vector<8x8xf32>
    %64 = tpu.matmul %60, %56, %cst_20 {dimension_numbers = #tpu.dot_dimension_numbers<[1], [1], [0], [0], [0, 0, 1, 0], [], []>} : vector<8x128xf32>, vector<8x128xf32>, vector<8x8xf32> -> vector<8x8xf32>
    %cst_21 = arith.constant 2.500000e-01 : f32
    %65 = vector.broadcast %cst_21 : f32 to vector<8x8xf32>
    %66 = arith.mulf %64, %65 : vector<8x8xf32>
    %67 = vector.broadcast %57 : vector<1x8xf32> to vector<8x8xf32>
    %68 = arith.addf %66, %67 : vector<8x8xf32>
    %cst_22 = arith.constant dense<0xFF800000> : vector<8xf32>
    %69 = vector.multi_reduction <maximumf>, %68, %cst_22 [1] : vector<8x8xf32> to vector<8xf32>
    %70 = vector.shape_cast %69 : vector<8xf32> to vector<8x1xf32>
    %71 = vector.broadcast %70 : vector<8x1xf32> to vector<8x8xf32>
    %72 = arith.subf %68, %71 : vector<8x8xf32>
    %73 = math.exp %72 : vector<8x8xf32>
    %cst_23 = arith.constant dense<0.000000e+00> : vector<8xf32>
    %74 = vector.multi_reduction <add>, %73, %cst_23 [1] : vector<8x8xf32> to vector<8xf32>
    %75 = vector.shape_cast %74 : vector<8xf32> to vector<8x1xf32>
    %76 = vector.broadcast %75 : vector<8x1xf32> to vector<8x8xf32>
    %77 = arith.divf %73, %76 : vector<8x8xf32>
    %cst_24 = arith.constant dense<0.000000e+00> : vector<8x128xf32>
    %78 = tpu.matmul %77, %63, %cst_24 {dimension_numbers = #tpu.dot_dimension_numbers<[1], [0], [0], [1], [0, 0, 1, 1], [], []>} : vector<8x8xf32>, vector<8x128xf32>, vector<8x128xf32> -> vector<8x128xf32>
    %79 = vector.extract_strided_slice %53 {offsets = [0, 0], sizes = [8, 128], strides = [1, 1]} : vector<16x128xf32> to vector<8x128xf32>
    %80 = vector.broadcast %18 : vector<1x128xf32> to vector<8x128xf32>
    %81 = arith.mulf %79, %80 : vector<8x128xf32>
    %82 = vector.extract_strided_slice %55 {offsets = [0, 0], sizes = [8, 128], strides = [1, 1]} : vector<16x128xf32> to vector<8x128xf32>
    %83 = vector.broadcast %18 : vector<1x128xf32> to vector<8x128xf32>
    %84 = arith.mulf %82, %83 : vector<8x128xf32>
    %cst_25 = arith.constant dense<0.000000e+00> : vector<8x8xf32>
    %85 = tpu.matmul %81, %56, %cst_25 {dimension_numbers = #tpu.dot_dimension_numbers<[1], [1], [0], [0], [0, 0, 1, 0], [], []>} : vector<8x128xf32>, vector<8x128xf32>, vector<8x8xf32> -> vector<8x8xf32>
    %cst_26 = arith.constant 2.500000e-01 : f32
    %86 = vector.broadcast %cst_26 : f32 to vector<8x8xf32>
    %87 = arith.mulf %85, %86 : vector<8x8xf32>
    %88 = vector.broadcast %57 : vector<1x8xf32> to vector<8x8xf32>
    %89 = arith.addf %87, %88 : vector<8x8xf32>
    %cst_27 = arith.constant dense<0xFF800000> : vector<8xf32>
    %90 = vector.multi_reduction <maximumf>, %89, %cst_27 [1] : vector<8x8xf32> to vector<8xf32>
    %91 = vector.shape_cast %90 : vector<8xf32> to vector<8x1xf32>
    %92 = vector.broadcast %91 : vector<8x1xf32> to vector<8x8xf32>
    %93 = arith.subf %89, %92 : vector<8x8xf32>
    %94 = math.exp %93 : vector<8x8xf32>
    %cst_28 = arith.constant dense<0.000000e+00> : vector<8xf32>
    %95 = vector.multi_reduction <add>, %94, %cst_28 [1] : vector<8x8xf32> to vector<8xf32>
    %96 = vector.shape_cast %95 : vector<8xf32> to vector<8x1xf32>
    %97 = vector.broadcast %96 : vector<8x1xf32> to vector<8x8xf32>
    %98 = arith.divf %94, %97 : vector<8x8xf32>
    %cst_29 = arith.constant dense<0.000000e+00> : vector<8x128xf32>
    %99 = tpu.matmul %98, %84, %cst_29 {dimension_numbers = #tpu.dot_dimension_numbers<[1], [0], [0], [1], [0, 0, 1, 1], [], []>} : vector<8x8xf32>, vector<8x128xf32>, vector<8x128xf32> -> vector<8x128xf32>
    %100 = arith.addf %78, %99 : vector<8x128xf32>
    %101 = vector.extract_strided_slice %54 {offsets = [8, 0], sizes = [8, 128], strides = [1, 1]} : vector<16x128xf32> to vector<8x128xf32>
    %102 = vector.extract_strided_slice %19 {offsets = [1, 0], sizes = [1, 8], strides = [1, 1]} : vector<2x128xf32> to vector<1x8xf32>
    %103 = vector.extract_strided_slice %53 {offsets = [8, 0], sizes = [8, 128], strides = [1, 1]} : vector<16x128xf32> to vector<8x128xf32>
    %104 = vector.broadcast %11 : vector<1x128xf32> to vector<8x128xf32>
    %105 = arith.mulf %103, %104 : vector<8x128xf32>
    %106 = vector.extract_strided_slice %55 {offsets = [8, 0], sizes = [8, 128], strides = [1, 1]} : vector<16x128xf32> to vector<8x128xf32>
    %107 = vector.broadcast %11 : vector<1x128xf32> to vector<8x128xf32>
    %108 = arith.mulf %106, %107 : vector<8x128xf32>
    %cst_30 = arith.constant dense<0.000000e+00> : vector<8x8xf32>
    %109 = tpu.matmul %105, %101, %cst_30 {dimension_numbers = #tpu.dot_dimension_numbers<[1], [1], [0], [0], [0, 0, 1, 0], [], []>} : vector<8x128xf32>, vector<8x128xf32>, vector<8x8xf32> -> vector<8x8xf32>
    %cst_31 = arith.constant 2.500000e-01 : f32
    %110 = vector.broadcast %cst_31 : f32 to vector<8x8xf32>
    %111 = arith.mulf %109, %110 : vector<8x8xf32>
    %112 = vector.broadcast %102 : vector<1x8xf32> to vector<8x8xf32>
    %113 = arith.addf %111, %112 : vector<8x8xf32>
    %cst_32 = arith.constant dense<0xFF800000> : vector<8xf32>
    %114 = vector.multi_reduction <maximumf>, %113, %cst_32 [1] : vector<8x8xf32> to vector<8xf32>
    %115 = vector.shape_cast %114 : vector<8xf32> to vector<8x1xf32>
    %116 = vector.broadcast %115 : vector<8x1xf32> to vector<8x8xf32>
    %117 = arith.subf %113, %116 : vector<8x8xf32>
    %118 = math.exp %117 : vector<8x8xf32>
    %cst_33 = arith.constant dense<0.000000e+00> : vector<8xf32>
    %119 = vector.multi_reduction <add>, %118, %cst_33 [1] : vector<8x8xf32> to vector<8xf32>
    %120 = vector.shape_cast %119 : vector<8xf32> to vector<8x1xf32>
    %121 = vector.broadcast %120 : vector<8x1xf32> to vector<8x8xf32>
    %122 = arith.divf %118, %121 : vector<8x8xf32>
    %cst_34 = arith.constant dense<0.000000e+00> : vector<8x128xf32>
    %123 = tpu.matmul %122, %108, %cst_34 {dimension_numbers = #tpu.dot_dimension_numbers<[1], [0], [0], [1], [0, 0, 1, 1], [], []>} : vector<8x8xf32>, vector<8x128xf32>, vector<8x128xf32> -> vector<8x128xf32>
    %124 = vector.extract_strided_slice %53 {offsets = [8, 0], sizes = [8, 128], strides = [1, 1]} : vector<16x128xf32> to vector<8x128xf32>
    %125 = vector.broadcast %18 : vector<1x128xf32> to vector<8x128xf32>
    %126 = arith.mulf %124, %125 : vector<8x128xf32>
    %127 = vector.extract_strided_slice %55 {offsets = [8, 0], sizes = [8, 128], strides = [1, 1]} : vector<16x128xf32> to vector<8x128xf32>
    %128 = vector.broadcast %18 : vector<1x128xf32> to vector<8x128xf32>
    %129 = arith.mulf %127, %128 : vector<8x128xf32>
    %cst_35 = arith.constant dense<0.000000e+00> : vector<8x8xf32>
    %130 = tpu.matmul %126, %101, %cst_35 {dimension_numbers = #tpu.dot_dimension_numbers<[1], [1], [0], [0], [0, 0, 1, 0], [], []>} : vector<8x128xf32>, vector<8x128xf32>, vector<8x8xf32> -> vector<8x8xf32>
    %cst_36 = arith.constant 2.500000e-01 : f32
    %131 = vector.broadcast %cst_36 : f32 to vector<8x8xf32>
    %132 = arith.mulf %130, %131 : vector<8x8xf32>
    %133 = vector.broadcast %102 : vector<1x8xf32> to vector<8x8xf32>
    %134 = arith.addf %132, %133 : vector<8x8xf32>
    %cst_37 = arith.constant dense<0xFF800000> : vector<8xf32>
    %135 = vector.multi_reduction <maximumf>, %134, %cst_37 [1] : vector<8x8xf32> to vector<8xf32>
    %136 = vector.shape_cast %135 : vector<8xf32> to vector<8x1xf32>
    %137 = vector.broadcast %136 : vector<8x1xf32> to vector<8x8xf32>
    %138 = arith.subf %134, %137 : vector<8x8xf32>
    %139 = math.exp %138 : vector<8x8xf32>
    %cst_38 = arith.constant dense<0.000000e+00> : vector<8xf32>
    %140 = vector.multi_reduction <add>, %139, %cst_38 [1] : vector<8x8xf32> to vector<8xf32>
    %141 = vector.shape_cast %140 : vector<8xf32> to vector<8x1xf32>
    %142 = vector.broadcast %141 : vector<8x1xf32> to vector<8x8xf32>
    %143 = arith.divf %139, %142 : vector<8x8xf32>
    %cst_39 = arith.constant dense<0.000000e+00> : vector<8x128xf32>
    %144 = tpu.matmul %143, %129, %cst_39 {dimension_numbers = #tpu.dot_dimension_numbers<[1], [0], [0], [1], [0, 0, 1, 1], [], []>} : vector<8x8xf32>, vector<8x128xf32>, vector<8x128xf32> -> vector<8x128xf32>
    %145 = arith.addf %123, %144 : vector<8x128xf32>
    %146 = tpu.concatenate %100, %145 in 0 : vector<8x128xf32>, vector<8x128xf32> -> vector<16x128xf32>
    %147 = arith.truncf %146 : vector<16x128xf32> to vector<16x128xbf16>
    %c0_40 = arith.constant 0 : index
    %c0_41 = arith.constant 0 : index
    %c0_42 = arith.constant 0 : index
    %148 = vector.load %arg6[%c0_40, %c0_41, %c0_42] : memref<2x128x128xbf16, #tpu.memory_space<vmem>>, vector<1x128x128xbf16>
    %149 = vector.shape_cast %148 : vector<1x128x128xbf16> to vector<128x128xbf16>
    %cst_43 = arith.constant dense<0.000000e+00> : vector<16x128xf32>
    %150 = tpu.matmul %147, %149, %cst_43 {dimension_numbers = #tpu.dot_dimension_numbers<[1], [0], [0], [1], [0, 0, 1, 1], [], []>} : vector<16x128xbf16>, vector<128x128xbf16>, vector<16x128xf32> -> vector<16x128xf32>
    %c0_44 = arith.constant 0 : index
    %c0_45 = arith.constant 0 : index
    %c0_46 = arith.constant 0 : index
    %151 = vector.load %arg7[%c0_44, %c0_45, %c0_46] : memref<2x1x128xf32, #tpu.memory_space<vmem>>, vector<1x1x128xf32>
    %152 = vector.shape_cast %151 : vector<1x1x128xf32> to vector<1x128xf32>
    %153 = vector.broadcast %152 : vector<1x128xf32> to vector<16x128xf32>
    %154 = arith.addf %150, %153 : vector<16x128xf32>
    %155 = arith.addf %44, %154 : vector<16x128xf32>
    %c0_47 = arith.constant 0 : index
    %c0_48 = arith.constant 0 : index
    %c0_49 = arith.constant 0 : index
    %156 = vector.load %arg8[%c0_47, %c0_48, %c0_49] : memref<2x1x128xf32, #tpu.memory_space<vmem>>, vector<1x1x128xf32>
    %157 = vector.shape_cast %156 : vector<1x1x128xf32> to vector<1x128xf32>
    %c0_50 = arith.constant 0 : index
    %c0_51 = arith.constant 0 : index
    %c0_52 = arith.constant 0 : index
    %158 = vector.load %arg9[%c0_50, %c0_51, %c0_52] : memref<2x1x128xf32, #tpu.memory_space<vmem>>, vector<1x1x128xf32>
    %159 = vector.shape_cast %158 : vector<1x1x128xf32> to vector<1x128xf32>
    %cst_53 = arith.constant dense<0.000000e+00> : vector<16xf32>
    %160 = vector.multi_reduction <add>, %155, %cst_53 [1] : vector<16x128xf32> to vector<16xf32>
    %161 = vector.shape_cast %160 : vector<16xf32> to vector<16x1xf32>
    %cst_54 = arith.constant 3.125000e-02 : f32
    %162 = vector.broadcast %cst_54 : f32 to vector<16x1xf32>
    %163 = arith.mulf %161, %162 : vector<16x1xf32>
    %164 = vector.broadcast %163 : vector<16x1xf32> to vector<16x128xf32>
    %165 = arith.subf %155, %164 : vector<16x128xf32>
    %166 = vector.broadcast %4 : vector<1x128xf32> to vector<16x128xf32>
    %167 = arith.mulf %165, %166 : vector<16x128xf32>
    %168 = arith.mulf %167, %167 : vector<16x128xf32>
    %cst_55 = arith.constant dense<0.000000e+00> : vector<16xf32>
    %169 = vector.multi_reduction <add>, %168, %cst_55 [1] : vector<16x128xf32> to vector<16xf32>
    %170 = vector.shape_cast %169 : vector<16xf32> to vector<16x1xf32>
    %cst_56 = arith.constant 3.125000e-02 : f32
    %171 = vector.broadcast %cst_56 : f32 to vector<16x1xf32>
    %172 = arith.mulf %170, %171 : vector<16x1xf32>
    %cst_57 = arith.constant 9.99999996E-13 : f32
    %173 = vector.broadcast %cst_57 : f32 to vector<16x1xf32>
    %174 = arith.addf %172, %173 : vector<16x1xf32>
    %175 = math.rsqrt %174 : vector<16x1xf32>
    %176 = vector.broadcast %175 : vector<16x1xf32> to vector<16x128xf32>
    %177 = arith.mulf %167, %176 : vector<16x128xf32>
    %178 = vector.broadcast %157 : vector<1x128xf32> to vector<16x128xf32>
    %179 = arith.mulf %177, %178 : vector<16x128xf32>
    %180 = vector.broadcast %159 : vector<1x128xf32> to vector<16x128xf32>
    %181 = arith.addf %179, %180 : vector<16x128xf32>
    %182 = arith.truncf %181 : vector<16x128xf32> to vector<16x128xbf16>
    %c0_58 = arith.constant 0 : index
    %c0_59 = arith.constant 0 : index
    %c0_60 = arith.constant 0 : index
    %183 = vector.load %arg10[%c0_58, %c0_59, %c0_60] : memref<2x128x128xbf16, #tpu.memory_space<vmem>>, vector<1x128x128xbf16>
    %184 = vector.shape_cast %183 : vector<1x128x128xbf16> to vector<128x128xbf16>
    %cst_61 = arith.constant dense<0.000000e+00> : vector<16x128xf32>
    %185 = tpu.matmul %182, %184, %cst_61 {dimension_numbers = #tpu.dot_dimension_numbers<[1], [0], [0], [1], [0, 0, 1, 1], [], []>} : vector<16x128xbf16>, vector<128x128xbf16>, vector<16x128xf32> -> vector<16x128xf32>
    %c0_62 = arith.constant 0 : index
    %c0_63 = arith.constant 0 : index
    %c0_64 = arith.constant 0 : index
    %186 = vector.load %arg11[%c0_62, %c0_63, %c0_64] : memref<2x1x128xf32, #tpu.memory_space<vmem>>, vector<1x1x128xf32>
    %187 = vector.shape_cast %186 : vector<1x1x128xf32> to vector<1x128xf32>
    %188 = vector.broadcast %187 : vector<1x128xf32> to vector<16x128xf32>
    %189 = arith.addf %185, %188 : vector<16x128xf32>
    %cst_65 = arith.constant 5.000000e-01 : f32
    %190 = vector.broadcast %cst_65 : f32 to vector<16x128xf32>
    %191 = arith.mulf %190, %189 : vector<16x128xf32>
    %cst_66 = arith.constant 4.471500e-02 : f32
    %192 = vector.broadcast %cst_66 : f32 to vector<16x128xf32>
    %193 = arith.mulf %192, %189 : vector<16x128xf32>
    %194 = arith.mulf %193, %189 : vector<16x128xf32>
    %195 = arith.mulf %194, %189 : vector<16x128xf32>
    %196 = arith.addf %189, %195 : vector<16x128xf32>
    %cst_67 = arith.constant 0.797884583 : f32
    %197 = vector.broadcast %cst_67 : f32 to vector<16x128xf32>
    %198 = arith.mulf %197, %196 : vector<16x128xf32>
    %199 = math.tanh %198 : vector<16x128xf32>
    %cst_68 = arith.constant 1.000000e+00 : f32
    %200 = vector.broadcast %cst_68 : f32 to vector<16x128xf32>
    %201 = arith.addf %200, %199 : vector<16x128xf32>
    %202 = arith.mulf %191, %201 : vector<16x128xf32>
    %203 = arith.truncf %202 : vector<16x128xf32> to vector<16x128xbf16>
    %c0_69 = arith.constant 0 : index
    %c0_70 = arith.constant 0 : index
    %c0_71 = arith.constant 0 : index
    %204 = vector.load %arg12[%c0_69, %c0_70, %c0_71] : memref<2x128x128xbf16, #tpu.memory_space<vmem>>, vector<1x128x128xbf16>
    %205 = vector.shape_cast %204 : vector<1x128x128xbf16> to vector<128x128xbf16>
    %cst_72 = arith.constant dense<0.000000e+00> : vector<16x128xf32>
    %206 = tpu.matmul %203, %205, %cst_72 {dimension_numbers = #tpu.dot_dimension_numbers<[1], [0], [0], [1], [0, 0, 1, 1], [], []>} : vector<16x128xbf16>, vector<128x128xbf16>, vector<16x128xf32> -> vector<16x128xf32>
    %c0_73 = arith.constant 0 : index
    %c0_74 = arith.constant 0 : index
    %c0_75 = arith.constant 0 : index
    %207 = vector.load %arg13[%c0_73, %c0_74, %c0_75] : memref<2x1x128xf32, #tpu.memory_space<vmem>>, vector<1x1x128xf32>
    %208 = vector.shape_cast %207 : vector<1x1x128xf32> to vector<1x128xf32>
    %209 = vector.broadcast %208 : vector<1x128xf32> to vector<16x128xf32>
    %210 = arith.addf %206, %209 : vector<16x128xf32>
    %211 = arith.addf %181, %210 : vector<16x128xf32>
    %c0_76 = arith.constant 0 : index
    %c0_77 = arith.constant 0 : index
    %c0_78 = arith.constant 0 : index
    %212 = vector.load %arg14[%c0_76, %c0_77, %c0_78] : memref<2x1x128xf32, #tpu.memory_space<vmem>>, vector<1x1x128xf32>
    %213 = vector.shape_cast %212 : vector<1x1x128xf32> to vector<1x128xf32>
    %c0_79 = arith.constant 0 : index
    %c0_80 = arith.constant 0 : index
    %c0_81 = arith.constant 0 : index
    %214 = vector.load %arg15[%c0_79, %c0_80, %c0_81] : memref<2x1x128xf32, #tpu.memory_space<vmem>>, vector<1x1x128xf32>
    %215 = vector.shape_cast %214 : vector<1x1x128xf32> to vector<1x128xf32>
    %cst_82 = arith.constant dense<0.000000e+00> : vector<16xf32>
    %216 = vector.multi_reduction <add>, %211, %cst_82 [1] : vector<16x128xf32> to vector<16xf32>
    %217 = vector.shape_cast %216 : vector<16xf32> to vector<16x1xf32>
    %cst_83 = arith.constant 3.125000e-02 : f32
    %218 = vector.broadcast %cst_83 : f32 to vector<16x1xf32>
    %219 = arith.mulf %217, %218 : vector<16x1xf32>
    %220 = vector.broadcast %219 : vector<16x1xf32> to vector<16x128xf32>
    %221 = arith.subf %211, %220 : vector<16x128xf32>
    %222 = vector.broadcast %4 : vector<1x128xf32> to vector<16x128xf32>
    %223 = arith.mulf %221, %222 : vector<16x128xf32>
    %224 = arith.mulf %223, %223 : vector<16x128xf32>
    %cst_84 = arith.constant dense<0.000000e+00> : vector<16xf32>
    %225 = vector.multi_reduction <add>, %224, %cst_84 [1] : vector<16x128xf32> to vector<16xf32>
    %226 = vector.shape_cast %225 : vector<16xf32> to vector<16x1xf32>
    %cst_85 = arith.constant 3.125000e-02 : f32
    %227 = vector.broadcast %cst_85 : f32 to vector<16x1xf32>
    %228 = arith.mulf %226, %227 : vector<16x1xf32>
    %cst_86 = arith.constant 9.99999996E-13 : f32
    %229 = vector.broadcast %cst_86 : f32 to vector<16x1xf32>
    %230 = arith.addf %228, %229 : vector<16x1xf32>
    %231 = math.rsqrt %230 : vector<16x1xf32>
    %232 = vector.broadcast %231 : vector<16x1xf32> to vector<16x128xf32>
    %233 = arith.mulf %223, %232 : vector<16x128xf32>
    %234 = vector.broadcast %213 : vector<1x128xf32> to vector<16x128xf32>
    %235 = arith.mulf %233, %234 : vector<16x128xf32>
    %236 = vector.broadcast %215 : vector<1x128xf32> to vector<16x128xf32>
    %237 = arith.addf %235, %236 : vector<16x128xf32>
    %238 = arith.truncf %237 : vector<16x128xf32> to vector<16x128xbf16>
    %c1 = arith.constant 1 : index
    %c0_87 = arith.constant 0 : index
    %c0_88 = arith.constant 0 : index
    %239 = vector.load %arg4[%c1, %c0_87, %c0_88] : memref<2x128x384xbf16, #tpu.memory_space<vmem>>, vector<1x128x384xbf16>
    %240 = vector.shape_cast %239 : vector<1x128x384xbf16> to vector<128x384xbf16>
    %cst_89 = arith.constant dense<0.000000e+00> : vector<16x384xf32>
    %241 = tpu.matmul %238, %240, %cst_89 {dimension_numbers = #tpu.dot_dimension_numbers<[1], [0], [0], [1], [0, 0, 1, 1], [], []>} : vector<16x128xbf16>, vector<128x384xbf16>, vector<16x384xf32> -> vector<16x384xf32>
    %c1_90 = arith.constant 1 : index
    %c0_91 = arith.constant 0 : index
    %c0_92 = arith.constant 0 : index
    %242 = vector.load %arg5[%c1_90, %c0_91, %c0_92] : memref<2x1x384xf32, #tpu.memory_space<vmem>>, vector<1x1x384xf32>
    %243 = vector.shape_cast %242 : vector<1x1x384xf32> to vector<1x384xf32>
    %244 = vector.broadcast %243 : vector<1x384xf32> to vector<16x384xf32>
    %245 = arith.addf %241, %244 : vector<16x384xf32>
    %246 = vector.extract_strided_slice %245 {offsets = [0, 0], sizes = [16, 128], strides = [1, 1]} : vector<16x384xf32> to vector<16x128xf32>
    %247 = vector.extract_strided_slice %245 {offsets = [0, 128], sizes = [16, 128], strides = [1, 1]} : vector<16x384xf32> to vector<16x128xf32>
    %248 = vector.extract_strided_slice %245 {offsets = [0, 256], sizes = [16, 128], strides = [1, 1]} : vector<16x384xf32> to vector<16x128xf32>
    %249 = vector.extract_strided_slice %247 {offsets = [0, 0], sizes = [8, 128], strides = [1, 1]} : vector<16x128xf32> to vector<8x128xf32>
    %250 = vector.extract_strided_slice %19 {offsets = [0, 0], sizes = [1, 8], strides = [1, 1]} : vector<2x128xf32> to vector<1x8xf32>
    %251 = vector.extract_strided_slice %246 {offsets = [0, 0], sizes = [8, 128], strides = [1, 1]} : vector<16x128xf32> to vector<8x128xf32>
    %252 = vector.broadcast %11 : vector<1x128xf32> to vector<8x128xf32>
    %253 = arith.mulf %251, %252 : vector<8x128xf32>
    %254 = vector.extract_strided_slice %248 {offsets = [0, 0], sizes = [8, 128], strides = [1, 1]} : vector<16x128xf32> to vector<8x128xf32>
    %255 = vector.broadcast %11 : vector<1x128xf32> to vector<8x128xf32>
    %256 = arith.mulf %254, %255 : vector<8x128xf32>
    %cst_93 = arith.constant dense<0.000000e+00> : vector<8x8xf32>
    %257 = tpu.matmul %253, %249, %cst_93 {dimension_numbers = #tpu.dot_dimension_numbers<[1], [1], [0], [0], [0, 0, 1, 0], [], []>} : vector<8x128xf32>, vector<8x128xf32>, vector<8x8xf32> -> vector<8x8xf32>
    %cst_94 = arith.constant 2.500000e-01 : f32
    %258 = vector.broadcast %cst_94 : f32 to vector<8x8xf32>
    %259 = arith.mulf %257, %258 : vector<8x8xf32>
    %260 = vector.broadcast %250 : vector<1x8xf32> to vector<8x8xf32>
    %261 = arith.addf %259, %260 : vector<8x8xf32>
    %cst_95 = arith.constant dense<0xFF800000> : vector<8xf32>
    %262 = vector.multi_reduction <maximumf>, %261, %cst_95 [1] : vector<8x8xf32> to vector<8xf32>
    %263 = vector.shape_cast %262 : vector<8xf32> to vector<8x1xf32>
    %264 = vector.broadcast %263 : vector<8x1xf32> to vector<8x8xf32>
    %265 = arith.subf %261, %264 : vector<8x8xf32>
    %266 = math.exp %265 : vector<8x8xf32>
    %cst_96 = arith.constant dense<0.000000e+00> : vector<8xf32>
    %267 = vector.multi_reduction <add>, %266, %cst_96 [1] : vector<8x8xf32> to vector<8xf32>
    %268 = vector.shape_cast %267 : vector<8xf32> to vector<8x1xf32>
    %269 = vector.broadcast %268 : vector<8x1xf32> to vector<8x8xf32>
    %270 = arith.divf %266, %269 : vector<8x8xf32>
    %cst_97 = arith.constant dense<0.000000e+00> : vector<8x128xf32>
    %271 = tpu.matmul %270, %256, %cst_97 {dimension_numbers = #tpu.dot_dimension_numbers<[1], [0], [0], [1], [0, 0, 1, 1], [], []>} : vector<8x8xf32>, vector<8x128xf32>, vector<8x128xf32> -> vector<8x128xf32>
    %272 = vector.extract_strided_slice %246 {offsets = [0, 0], sizes = [8, 128], strides = [1, 1]} : vector<16x128xf32> to vector<8x128xf32>
    %273 = vector.broadcast %18 : vector<1x128xf32> to vector<8x128xf32>
    %274 = arith.mulf %272, %273 : vector<8x128xf32>
    %275 = vector.extract_strided_slice %248 {offsets = [0, 0], sizes = [8, 128], strides = [1, 1]} : vector<16x128xf32> to vector<8x128xf32>
    %276 = vector.broadcast %18 : vector<1x128xf32> to vector<8x128xf32>
    %277 = arith.mulf %275, %276 : vector<8x128xf32>
    %cst_98 = arith.constant dense<0.000000e+00> : vector<8x8xf32>
    %278 = tpu.matmul %274, %249, %cst_98 {dimension_numbers = #tpu.dot_dimension_numbers<[1], [1], [0], [0], [0, 0, 1, 0], [], []>} : vector<8x128xf32>, vector<8x128xf32>, vector<8x8xf32> -> vector<8x8xf32>
    %cst_99 = arith.constant 2.500000e-01 : f32
    %279 = vector.broadcast %cst_99 : f32 to vector<8x8xf32>
    %280 = arith.mulf %278, %279 : vector<8x8xf32>
    %281 = vector.broadcast %250 : vector<1x8xf32> to vector<8x8xf32>
    %282 = arith.addf %280, %281 : vector<8x8xf32>
    %cst_100 = arith.constant dense<0xFF800000> : vector<8xf32>
    %283 = vector.multi_reduction <maximumf>, %282, %cst_100 [1] : vector<8x8xf32> to vector<8xf32>
    %284 = vector.shape_cast %283 : vector<8xf32> to vector<8x1xf32>
    %285 = vector.broadcast %284 : vector<8x1xf32> to vector<8x8xf32>
    %286 = arith.subf %282, %285 : vector<8x8xf32>
    %287 = math.exp %286 : vector<8x8xf32>
    %cst_101 = arith.constant dense<0.000000e+00> : vector<8xf32>
    %288 = vector.multi_reduction <add>, %287, %cst_101 [1] : vector<8x8xf32> to vector<8xf32>
    %289 = vector.shape_cast %288 : vector<8xf32> to vector<8x1xf32>
    %290 = vector.broadcast %289 : vector<8x1xf32> to vector<8x8xf32>
    %291 = arith.divf %287, %290 : vector<8x8xf32>
    %cst_102 = arith.constant dense<0.000000e+00> : vector<8x128xf32>
    %292 = tpu.matmul %291, %277, %cst_102 {dimension_numbers = #tpu.dot_dimension_numbers<[1], [0], [0], [1], [0, 0, 1, 1], [], []>} : vector<8x8xf32>, vector<8x128xf32>, vector<8x128xf32> -> vector<8x128xf32>
    %293 = arith.addf %271, %292 : vector<8x128xf32>
    %294 = vector.extract_strided_slice %247 {offsets = [8, 0], sizes = [8, 128], strides = [1, 1]} : vector<16x128xf32> to vector<8x128xf32>
    %295 = vector.extract_strided_slice %19 {offsets = [1, 0], sizes = [1, 8], strides = [1, 1]} : vector<2x128xf32> to vector<1x8xf32>
    %296 = vector.extract_strided_slice %246 {offsets = [8, 0], sizes = [8, 128], strides = [1, 1]} : vector<16x128xf32> to vector<8x128xf32>
    %297 = vector.broadcast %11 : vector<1x128xf32> to vector<8x128xf32>
    %298 = arith.mulf %296, %297 : vector<8x128xf32>
    %299 = vector.extract_strided_slice %248 {offsets = [8, 0], sizes = [8, 128], strides = [1, 1]} : vector<16x128xf32> to vector<8x128xf32>
    %300 = vector.broadcast %11 : vector<1x128xf32> to vector<8x128xf32>
    %301 = arith.mulf %299, %300 : vector<8x128xf32>
    %cst_103 = arith.constant dense<0.000000e+00> : vector<8x8xf32>
    %302 = tpu.matmul %298, %294, %cst_103 {dimension_numbers = #tpu.dot_dimension_numbers<[1], [1], [0], [0], [0, 0, 1, 0], [], []>} : vector<8x128xf32>, vector<8x128xf32>, vector<8x8xf32> -> vector<8x8xf32>
    %cst_104 = arith.constant 2.500000e-01 : f32
    %303 = vector.broadcast %cst_104 : f32 to vector<8x8xf32>
    %304 = arith.mulf %302, %303 : vector<8x8xf32>
    %305 = vector.broadcast %295 : vector<1x8xf32> to vector<8x8xf32>
    %306 = arith.addf %304, %305 : vector<8x8xf32>
    %cst_105 = arith.constant dense<0xFF800000> : vector<8xf32>
    %307 = vector.multi_reduction <maximumf>, %306, %cst_105 [1] : vector<8x8xf32> to vector<8xf32>
    %308 = vector.shape_cast %307 : vector<8xf32> to vector<8x1xf32>
    %309 = vector.broadcast %308 : vector<8x1xf32> to vector<8x8xf32>
    %310 = arith.subf %306, %309 : vector<8x8xf32>
    %311 = math.exp %310 : vector<8x8xf32>
    %cst_106 = arith.constant dense<0.000000e+00> : vector<8xf32>
    %312 = vector.multi_reduction <add>, %311, %cst_106 [1] : vector<8x8xf32> to vector<8xf32>
    %313 = vector.shape_cast %312 : vector<8xf32> to vector<8x1xf32>
    %314 = vector.broadcast %313 : vector<8x1xf32> to vector<8x8xf32>
    %315 = arith.divf %311, %314 : vector<8x8xf32>
    %cst_107 = arith.constant dense<0.000000e+00> : vector<8x128xf32>
    %316 = tpu.matmul %315, %301, %cst_107 {dimension_numbers = #tpu.dot_dimension_numbers<[1], [0], [0], [1], [0, 0, 1, 1], [], []>} : vector<8x8xf32>, vector<8x128xf32>, vector<8x128xf32> -> vector<8x128xf32>
    %317 = vector.extract_strided_slice %246 {offsets = [8, 0], sizes = [8, 128], strides = [1, 1]} : vector<16x128xf32> to vector<8x128xf32>
    %318 = vector.broadcast %18 : vector<1x128xf32> to vector<8x128xf32>
    %319 = arith.mulf %317, %318 : vector<8x128xf32>
    %320 = vector.extract_strided_slice %248 {offsets = [8, 0], sizes = [8, 128], strides = [1, 1]} : vector<16x128xf32> to vector<8x128xf32>
    %321 = vector.broadcast %18 : vector<1x128xf32> to vector<8x128xf32>
    %322 = arith.mulf %320, %321 : vector<8x128xf32>
    %cst_108 = arith.constant dense<0.000000e+00> : vector<8x8xf32>
    %323 = tpu.matmul %319, %294, %cst_108 {dimension_numbers = #tpu.dot_dimension_numbers<[1], [1], [0], [0], [0, 0, 1, 0], [], []>} : vector<8x128xf32>, vector<8x128xf32>, vector<8x8xf32> -> vector<8x8xf32>
    %cst_109 = arith.constant 2.500000e-01 : f32
    %324 = vector.broadcast %cst_109 : f32 to vector<8x8xf32>
    %325 = arith.mulf %323, %324 : vector<8x8xf32>
    %326 = vector.broadcast %295 : vector<1x8xf32> to vector<8x8xf32>
    %327 = arith.addf %325, %326 : vector<8x8xf32>
    %cst_110 = arith.constant dense<0xFF800000> : vector<8xf32>
    %328 = vector.multi_reduction <maximumf>, %327, %cst_110 [1] : vector<8x8xf32> to vector<8xf32>
    %329 = vector.shape_cast %328 : vector<8xf32> to vector<8x1xf32>
    %330 = vector.broadcast %329 : vector<8x1xf32> to vector<8x8xf32>
    %331 = arith.subf %327, %330 : vector<8x8xf32>
    %332 = math.exp %331 : vector<8x8xf32>
    %cst_111 = arith.constant dense<0.000000e+00> : vector<8xf32>
    %333 = vector.multi_reduction <add>, %332, %cst_111 [1] : vector<8x8xf32> to vector<8xf32>
    %334 = vector.shape_cast %333 : vector<8xf32> to vector<8x1xf32>
    %335 = vector.broadcast %334 : vector<8x1xf32> to vector<8x8xf32>
    %336 = arith.divf %332, %335 : vector<8x8xf32>
    %cst_112 = arith.constant dense<0.000000e+00> : vector<8x128xf32>
    %337 = tpu.matmul %336, %322, %cst_112 {dimension_numbers = #tpu.dot_dimension_numbers<[1], [0], [0], [1], [0, 0, 1, 1], [], []>} : vector<8x8xf32>, vector<8x128xf32>, vector<8x128xf32> -> vector<8x128xf32>
    %338 = arith.addf %316, %337 : vector<8x128xf32>
    %339 = tpu.concatenate %293, %338 in 0 : vector<8x128xf32>, vector<8x128xf32> -> vector<16x128xf32>
    %340 = arith.truncf %339 : vector<16x128xf32> to vector<16x128xbf16>
    %c1_113 = arith.constant 1 : index
    %c0_114 = arith.constant 0 : index
    %c0_115 = arith.constant 0 : index
    %341 = vector.load %arg6[%c1_113, %c0_114, %c0_115] : memref<2x128x128xbf16, #tpu.memory_space<vmem>>, vector<1x128x128xbf16>
    %342 = vector.shape_cast %341 : vector<1x128x128xbf16> to vector<128x128xbf16>
    %cst_116 = arith.constant dense<0.000000e+00> : vector<16x128xf32>
    %343 = tpu.matmul %340, %342, %cst_116 {dimension_numbers = #tpu.dot_dimension_numbers<[1], [0], [0], [1], [0, 0, 1, 1], [], []>} : vector<16x128xbf16>, vector<128x128xbf16>, vector<16x128xf32> -> vector<16x128xf32>
    %c1_117 = arith.constant 1 : index
    %c0_118 = arith.constant 0 : index
    %c0_119 = arith.constant 0 : index
    %344 = vector.load %arg7[%c1_117, %c0_118, %c0_119] : memref<2x1x128xf32, #tpu.memory_space<vmem>>, vector<1x1x128xf32>
    %345 = vector.shape_cast %344 : vector<1x1x128xf32> to vector<1x128xf32>
    %346 = vector.broadcast %345 : vector<1x128xf32> to vector<16x128xf32>
    %347 = arith.addf %343, %346 : vector<16x128xf32>
    %348 = arith.addf %237, %347 : vector<16x128xf32>
    %c1_120 = arith.constant 1 : index
    %c0_121 = arith.constant 0 : index
    %c0_122 = arith.constant 0 : index
    %349 = vector.load %arg8[%c1_120, %c0_121, %c0_122] : memref<2x1x128xf32, #tpu.memory_space<vmem>>, vector<1x1x128xf32>
    %350 = vector.shape_cast %349 : vector<1x1x128xf32> to vector<1x128xf32>
    %c1_123 = arith.constant 1 : index
    %c0_124 = arith.constant 0 : index
    %c0_125 = arith.constant 0 : index
    %351 = vector.load %arg9[%c1_123, %c0_124, %c0_125] : memref<2x1x128xf32, #tpu.memory_space<vmem>>, vector<1x1x128xf32>
    %352 = vector.shape_cast %351 : vector<1x1x128xf32> to vector<1x128xf32>
    %cst_126 = arith.constant dense<0.000000e+00> : vector<16xf32>
    %353 = vector.multi_reduction <add>, %348, %cst_126 [1] : vector<16x128xf32> to vector<16xf32>
    %354 = vector.shape_cast %353 : vector<16xf32> to vector<16x1xf32>
    %cst_127 = arith.constant 3.125000e-02 : f32
    %355 = vector.broadcast %cst_127 : f32 to vector<16x1xf32>
    %356 = arith.mulf %354, %355 : vector<16x1xf32>
    %357 = vector.broadcast %356 : vector<16x1xf32> to vector<16x128xf32>
    %358 = arith.subf %348, %357 : vector<16x128xf32>
    %359 = vector.broadcast %4 : vector<1x128xf32> to vector<16x128xf32>
    %360 = arith.mulf %358, %359 : vector<16x128xf32>
    %361 = arith.mulf %360, %360 : vector<16x128xf32>
    %cst_128 = arith.constant dense<0.000000e+00> : vector<16xf32>
    %362 = vector.multi_reduction <add>, %361, %cst_128 [1] : vector<16x128xf32> to vector<16xf32>
    %363 = vector.shape_cast %362 : vector<16xf32> to vector<16x1xf32>
    %cst_129 = arith.constant 3.125000e-02 : f32
    %364 = vector.broadcast %cst_129 : f32 to vector<16x1xf32>
    %365 = arith.mulf %363, %364 : vector<16x1xf32>
    %cst_130 = arith.constant 9.99999996E-13 : f32
    %366 = vector.broadcast %cst_130 : f32 to vector<16x1xf32>
    %367 = arith.addf %365, %366 : vector<16x1xf32>
    %368 = math.rsqrt %367 : vector<16x1xf32>
    %369 = vector.broadcast %368 : vector<16x1xf32> to vector<16x128xf32>
    %370 = arith.mulf %360, %369 : vector<16x128xf32>
    %371 = vector.broadcast %350 : vector<1x128xf32> to vector<16x128xf32>
    %372 = arith.mulf %370, %371 : vector<16x128xf32>
    %373 = vector.broadcast %352 : vector<1x128xf32> to vector<16x128xf32>
    %374 = arith.addf %372, %373 : vector<16x128xf32>
    %375 = arith.truncf %374 : vector<16x128xf32> to vector<16x128xbf16>
    %c1_131 = arith.constant 1 : index
    %c0_132 = arith.constant 0 : index
    %c0_133 = arith.constant 0 : index
    %376 = vector.load %arg10[%c1_131, %c0_132, %c0_133] : memref<2x128x128xbf16, #tpu.memory_space<vmem>>, vector<1x128x128xbf16>
    %377 = vector.shape_cast %376 : vector<1x128x128xbf16> to vector<128x128xbf16>
    %cst_134 = arith.constant dense<0.000000e+00> : vector<16x128xf32>
    %378 = tpu.matmul %375, %377, %cst_134 {dimension_numbers = #tpu.dot_dimension_numbers<[1], [0], [0], [1], [0, 0, 1, 1], [], []>} : vector<16x128xbf16>, vector<128x128xbf16>, vector<16x128xf32> -> vector<16x128xf32>
    %c1_135 = arith.constant 1 : index
    %c0_136 = arith.constant 0 : index
    %c0_137 = arith.constant 0 : index
    %379 = vector.load %arg11[%c1_135, %c0_136, %c0_137] : memref<2x1x128xf32, #tpu.memory_space<vmem>>, vector<1x1x128xf32>
    %380 = vector.shape_cast %379 : vector<1x1x128xf32> to vector<1x128xf32>
    %381 = vector.broadcast %380 : vector<1x128xf32> to vector<16x128xf32>
    %382 = arith.addf %378, %381 : vector<16x128xf32>
    %cst_138 = arith.constant 5.000000e-01 : f32
    %383 = vector.broadcast %cst_138 : f32 to vector<16x128xf32>
    %384 = arith.mulf %383, %382 : vector<16x128xf32>
    %cst_139 = arith.constant 4.471500e-02 : f32
    %385 = vector.broadcast %cst_139 : f32 to vector<16x128xf32>
    %386 = arith.mulf %385, %382 : vector<16x128xf32>
    %387 = arith.mulf %386, %382 : vector<16x128xf32>
    %388 = arith.mulf %387, %382 : vector<16x128xf32>
    %389 = arith.addf %382, %388 : vector<16x128xf32>
    %cst_140 = arith.constant 0.797884583 : f32
    %390 = vector.broadcast %cst_140 : f32 to vector<16x128xf32>
    %391 = arith.mulf %390, %389 : vector<16x128xf32>
    %392 = math.tanh %391 : vector<16x128xf32>
    %cst_141 = arith.constant 1.000000e+00 : f32
    %393 = vector.broadcast %cst_141 : f32 to vector<16x128xf32>
    %394 = arith.addf %393, %392 : vector<16x128xf32>
    %395 = arith.mulf %384, %394 : vector<16x128xf32>
    %396 = arith.truncf %395 : vector<16x128xf32> to vector<16x128xbf16>
    %c1_142 = arith.constant 1 : index
    %c0_143 = arith.constant 0 : index
    %c0_144 = arith.constant 0 : index
    %397 = vector.load %arg12[%c1_142, %c0_143, %c0_144] : memref<2x128x128xbf16, #tpu.memory_space<vmem>>, vector<1x128x128xbf16>
    %398 = vector.shape_cast %397 : vector<1x128x128xbf16> to vector<128x128xbf16>
    %cst_145 = arith.constant dense<0.000000e+00> : vector<16x128xf32>
    %399 = tpu.matmul %396, %398, %cst_145 {dimension_numbers = #tpu.dot_dimension_numbers<[1], [0], [0], [1], [0, 0, 1, 1], [], []>} : vector<16x128xbf16>, vector<128x128xbf16>, vector<16x128xf32> -> vector<16x128xf32>
    %c1_146 = arith.constant 1 : index
    %c0_147 = arith.constant 0 : index
    %c0_148 = arith.constant 0 : index
    %400 = vector.load %arg13[%c1_146, %c0_147, %c0_148] : memref<2x1x128xf32, #tpu.memory_space<vmem>>, vector<1x1x128xf32>
    %401 = vector.shape_cast %400 : vector<1x1x128xf32> to vector<1x128xf32>
    %402 = vector.broadcast %401 : vector<1x128xf32> to vector<16x128xf32>
    %403 = arith.addf %399, %402 : vector<16x128xf32>
    %404 = arith.addf %374, %403 : vector<16x128xf32>
    %c1_149 = arith.constant 1 : index
    %c0_150 = arith.constant 0 : index
    %c0_151 = arith.constant 0 : index
    %405 = vector.load %arg14[%c1_149, %c0_150, %c0_151] : memref<2x1x128xf32, #tpu.memory_space<vmem>>, vector<1x1x128xf32>
    %406 = vector.shape_cast %405 : vector<1x1x128xf32> to vector<1x128xf32>
    %c1_152 = arith.constant 1 : index
    %c0_153 = arith.constant 0 : index
    %c0_154 = arith.constant 0 : index
    %407 = vector.load %arg15[%c1_152, %c0_153, %c0_154] : memref<2x1x128xf32, #tpu.memory_space<vmem>>, vector<1x1x128xf32>
    %408 = vector.shape_cast %407 : vector<1x1x128xf32> to vector<1x128xf32>
    %cst_155 = arith.constant dense<0.000000e+00> : vector<16xf32>
    %409 = vector.multi_reduction <add>, %404, %cst_155 [1] : vector<16x128xf32> to vector<16xf32>
    %410 = vector.shape_cast %409 : vector<16xf32> to vector<16x1xf32>
    %cst_156 = arith.constant 3.125000e-02 : f32
    %411 = vector.broadcast %cst_156 : f32 to vector<16x1xf32>
    %412 = arith.mulf %410, %411 : vector<16x1xf32>
    %413 = vector.broadcast %412 : vector<16x1xf32> to vector<16x128xf32>
    %414 = arith.subf %404, %413 : vector<16x128xf32>
    %415 = vector.broadcast %4 : vector<1x128xf32> to vector<16x128xf32>
    %416 = arith.mulf %414, %415 : vector<16x128xf32>
    %417 = arith.mulf %416, %416 : vector<16x128xf32>
    %cst_157 = arith.constant dense<0.000000e+00> : vector<16xf32>
    %418 = vector.multi_reduction <add>, %417, %cst_157 [1] : vector<16x128xf32> to vector<16xf32>
    %419 = vector.shape_cast %418 : vector<16xf32> to vector<16x1xf32>
    %cst_158 = arith.constant 3.125000e-02 : f32
    %420 = vector.broadcast %cst_158 : f32 to vector<16x1xf32>
    %421 = arith.mulf %419, %420 : vector<16x1xf32>
    %cst_159 = arith.constant 9.99999996E-13 : f32
    %422 = vector.broadcast %cst_159 : f32 to vector<16x1xf32>
    %423 = arith.addf %421, %422 : vector<16x1xf32>
    %424 = math.rsqrt %423 : vector<16x1xf32>
    %425 = vector.broadcast %424 : vector<16x1xf32> to vector<16x128xf32>
    %426 = arith.mulf %416, %425 : vector<16x128xf32>
    %427 = vector.broadcast %406 : vector<1x128xf32> to vector<16x128xf32>
    %428 = arith.mulf %426, %427 : vector<16x128xf32>
    %429 = vector.broadcast %408 : vector<1x128xf32> to vector<16x128xf32>
    %430 = arith.addf %428, %429 : vector<16x128xf32>
    %431 = vector.extract_strided_slice %430 {offsets = [0, 0], sizes = [1, 128], strides = [1, 1]} : vector<16x128xf32> to vector<1x128xf32>
    %432 = vector.extract_strided_slice %430 {offsets = [8, 0], sizes = [1, 128], strides = [1, 1]} : vector<16x128xf32> to vector<1x128xf32>
    %433 = tpu.concatenate %431, %432 in 0 : vector<1x128xf32>, vector<1x128xf32> -> vector<2x128xf32>
    %434 = arith.truncf %433 : vector<2x128xf32> to vector<2x128xbf16>
    %c0_160 = arith.constant 0 : index
    %c0_161 = arith.constant 0 : index
    %435 = vector.load %arg16[%c0_160, %c0_161] : memref<128x128xbf16, #tpu.memory_space<vmem>>, vector<128x128xbf16>
    %cst_162 = arith.constant dense<0.000000e+00> : vector<2x128xf32>
    %436 = tpu.matmul %434, %435, %cst_162 {dimension_numbers = #tpu.dot_dimension_numbers<[1], [0], [0], [1], [0, 0, 1, 1], [], []>} : vector<2x128xbf16>, vector<128x128xbf16>, vector<2x128xf32> -> vector<2x128xf32>
    %c0_163 = arith.constant 0 : index
    %c0_164 = arith.constant 0 : index
    %437 = vector.load %arg17[%c0_163, %c0_164] : memref<1x128xf32, #tpu.memory_space<vmem>>, vector<1x128xf32>
    %438 = vector.broadcast %437 : vector<1x128xf32> to vector<2x128xf32>
    %439 = arith.addf %436, %438 : vector<2x128xf32>
    %440 = math.tanh %439 : vector<2x128xf32>
    %441 = arith.truncf %440 : vector<2x128xf32> to vector<2x128xbf16>
    %c0_165 = arith.constant 0 : index
    %c0_166 = arith.constant 0 : index
    %442 = vector.load %arg18[%c0_165, %c0_166] : memref<128x128xbf16, #tpu.memory_space<vmem>>, vector<128x128xbf16>
    %cst_167 = arith.constant dense<0.000000e+00> : vector<2x128xf32>
    %443 = tpu.matmul %441, %442, %cst_167 {dimension_numbers = #tpu.dot_dimension_numbers<[1], [0], [0], [1], [0, 0, 1, 1], [], []>} : vector<2x128xbf16>, vector<128x128xbf16>, vector<2x128xf32> -> vector<2x128xf32>
    %c0_168 = arith.constant 0 : index
    %c0_169 = arith.constant 0 : index
    %444 = vector.load %arg19[%c0_168, %c0_169] : memref<1x128xf32, #tpu.memory_space<vmem>>, vector<1x128xf32>
    %445 = vector.broadcast %444 : vector<1x128xf32> to vector<2x128xf32>
    %446 = arith.addf %443, %445 : vector<2x128xf32>
    %c0_170 = arith.constant 0 : index
    %c0_171 = arith.constant 0 : index
    %447 = vector.load %arg20[%c0_170, %c0_171] : memref<2x128xf32, #tpu.memory_space<vmem>>, vector<2x128xf32>
    tpu.vector_store %arg20[%c0_170, %c0_171], %446 {strides = array<i32>} : memref<2x128xf32, #tpu.memory_space<vmem>>, vector<2x128xf32>,
    return
  }
}

</mosaic_0001>

<bundles_post_ra>
// kernel: bert_forward.1
= control target key start
LH: loop header
LB: loop body
LE: loop exit
PB: predicated region body
PF: predicated region fallthrough
CT: control target
= control target key end

     0   :  { %s3408_s0 = inlined_call_operand.vmem [shape: f32[16,128], index: 0, kind: input, shape index: {}]   ;;  %s3409_s1 = inlined_call_operand.vmem [shape: f32[2,128], index: 1, kind: input, shape index: {}]   ;;  %s3410_s2 = inlined_call_operand.vmem [shape: f32[1,128], index: 2, kind: input, shape index: {}]   ;;  %s3411_s3 = inlined_call_operand.vmem [shape: f32[1,128], index: 3, kind: input, shape index: {}]   ;;  %s3412_s4 = inlined_call_operand.hbm [shape: bf16[2,128,384], index: 4, kind: input, shape index: {}]   ;;  %s3413_s5 = inlined_call_operand.vmem [shape: f32[2,1,384], index: 5, kind: input, shape index: {}]   ;;  %s3414_s6 = inlined_call_operand.vmem [shape: bf16[2,128,128], index: 6, kind: input, shape index: {}]   ;;  %s3415_s7 = inlined_call_operand.vmem [shape: f32[2,1,128], index: 7, kind: input, shape index: {}]   ;;  %s3416_s8 = inlined_call_operand.vmem [shape: f32[2,1,128], index: 8, kind: input, shape index: {}]   ;;  %s3417_s9 = inlined_call_operand.vmem [shape: f32[2,1,128], index: 9, kind: input, shape index: {}]   ;;  %s3418_s10 = inlined_call_operand.vmem [shape: bf16[2,128,128], index: 10, kind: input, shape index: {}]   ;;  %s3419_s11 = inlined_call_operand.vmem [shape: f32[2,1,128], index: 11, kind: input, shape index: {}]   ;;  %s3420_s12 = inlined_call_operand.hbm [shape: bf16[2,128,128], index: 12, kind: input, shape index: {}]   ;;  %s3421_s13 = inlined_call_operand.vmem [shape: f32[2,1,128], index: 13, kind: input, shape index: {}]   ;;  %s3422_s14 = inlined_call_operand.vmem [shape: f32[2,1,128], index: 14, kind: input, shape index: {}]   ;;  %s3423_s15 = inlined_call_operand.vmem [shape: f32[2,1,128], index: 15, kind: input, shape index: {}]   ;;  %s3424_s16 = inlined_call_operand.vmem [shape: bf16[128,128], index: 16, kind: input, shape index: {}]   ;;  %s3425_s17 = inlined_call_operand.vmem [shape: f32[1,128], index: 17, kind: input, shape index: {}]   ;;  %s3426_s18 = inlined_call_operand.hbm [shape: bf16[128,128], index: 18, kind: input, shape index: {}]   ;;  %s3427_s19 = inlined_call_operand.vmem [shape: f32[1,128], index: 19, kind: input, shape index: {}]   ;;  %s3428_s20 = inlined_call_operand.hbm [shape: f32[2,128], index: 20, kind: output, shape index: {}]  }
   0x1   :  { %3430 = sst [smem:[#allocation12_spill]] %s3408_s0 }
   0x2   :  { %3431 = sst [smem:[#allocation13_spill]] %s3409_s1 }
   0x3   :  { %3432 = sst [smem:[#allocation14_spill]] %s3410_s2 }
   0x4   :  { %3433 = sst [smem:[#allocation15_spill]] %s3411_s3 }
   0x5   :  { %3434 = sst [smem:[#allocation16_spill]] %s3412_s4 }
   0x6   :  { %3435 = sst [smem:[#allocation17_spill]] %s3428_s20 }
   0x7   :  { %25 = vsyncpa [#allocation3], 0 }
   0x8   :  { %26 = vsyncpa [#allocation6], 0  ;;  %s67_s23 = sshll.u32 %s3420_s12, 4  ;;  %s68_s23 = int_to_ptr.hbm [resolvable:$true] %s67_s23 }
   0x9   :  { %27 = vsyncpa [#allocation4], 0  ;;  %s2938_s24 = smov [#allocation5]   ;;  %s3436_s26 = sld [smem:[#allocation16_spill]] }
   0xa   :  { %s69_s2 = sshll.u32 %s2938_s24, 4  ;;  %s2939_s28 = smov 64   ;;  %s70_s2 = int_to_ptr.vmem [resolvable:$true] %s69_s2 }
   0xb   :  { %s2940_s4 = smov 4   ;;  %s2941_s29 = smov [#allocation2]  }
   0xc   :  { %75 = dma.hbm_to_vmem [thread:$0]  %s68_s23, 2048, %s70_s2, [#allocation6], %s2939_s28, %s2939_s28, %s2940_s4  }
   0xd   :  { %s42_s30 = sshll.u32 %s2941_s29, 4  ;;  %s2942_s0 = smov 192   ;;  %s43_s30 = int_to_ptr.vmem [resolvable:$true] %s42_s30 }
   0xe   :  { %s2943_s21 = smov 12   ;;  %s90_s22 = sshll.u32 %s3426_s18, 4  ;;  %s91_s22 = int_to_ptr.hbm [resolvable:$true] %s90_s22 }
   0xf   :  { %s40_s27 = sshll.u32 %s3436_s26, 4  ;;  %s2944_s24 = smov [#allocation7]   ;;  %s41_s27 = int_to_ptr.hbm [resolvable:$true] %s40_s27 }
  0x10   :  { %48 = dma.hbm_to_vmem [thread:$0]  %s41_s27, 6144, %s43_s30, [#allocation3], %s2942_s0, %s2942_s0, %s2943_s21  }
  0x11   :  { %s92_s20 = sshll.u32 %s2944_s24, 4  ;;  %s93_s20 = int_to_ptr.vmem [resolvable:$true] %s92_s20 }
  0x12   :  { %98 = dma.hbm_to_vmem [thread:$0]  %s91_s22, 1024, %s93_s20, [#allocation6], %s2939_s28, %s2939_s28, %s2940_s4  }
  0x13   :  { %2932 = dma.done.wait [#allocation3], 6144  }
  0x14   :  { %2933 = vsyncadd [#allocation3], 4294961152 }
  0x15   :  { %2934 = dma.done.wait [#allocation6], 3072  }
  0x16   :  { %2935 = vsyncadd [#allocation6], 4294964224  ;;  %s3437_s25 = sld [smem:[#allocation12_spill]]  ;;  %v113_v2 = vlaneseq  ;;  %v2945_v6 = vmov 0.0   ;;  %v2225_v16 = vld [vmem:[#allocation2 + $0xa8] sm:$0xf] }
  0x17   :  { %v2657_v17 = vld [vmem:[#allocation2 + $0xb0] sm:$0xf0]  ;;  %v2656_v18 = vld [vmem:[#allocation2 + $0xac] sm:$0xf]  ;;  %v2227_v20 = vld [vmem:[#allocation2 + $0xb4] sm:$0xf0] }
  0x18   :  { %v3067_v3 = vand.u32 127, %v113_v2  ;;  %v2226_v19 = vor.u32 %v2657_v17, %v2225_v16  ;;  %v2233_v21 = vld [vmem:[#allocation2 + $0xb0] sm:$0xf]  ;;  %v2658_v22 = vld [vmem:[#allocation2 + $0xb8] sm:$0xf0]  ;;  %v2230_v23 = vor.u32 %v2656_v18, %v2227_v20  ;;  %s3438_s27 = sld [smem:[#allocation14_spill]] }
  0x19   :  { %v2234_v24 = vor.u32 %v2658_v22, %v2233_v21  ;;  %v2213_v25 = vld [vmem:[#allocation2 + $0x90] sm:$0xf]  ;;  %v2654_v26 = vld [vmem:[#allocation2 + $0x98] sm:$0xf0]  ;;  %v2653_v27 = vld [vmem:[#allocation2 + $0x94] sm:$0xf] }
  0x1a   :  { %vm115_vm0 = vcmp.lt.s32.totalorder %v3067_v3, 32  ;;  %353 = vmatpush.bf16.msra.mxu0 %v2226_v19  ;;  %367 = vmatpush.bf16.msra.mxu1 %v2230_v23  ;;  %v2214_v28 = vor.u32 %v2654_v26, %v2213_v25  ;;  %v2215_v29 = vld [vmem:[#allocation2 + $0x9c] sm:$0xf0]  ;;  %v2221_v30 = vld [vmem:[#allocation2 + $0x98] sm:$0xf]  ;;  %s3439_s29 = sld [smem:[#allocation15_spill]] }
  0x1b   :  { %v3073_v7 = vsel %vm115_vm0, 1.0, %v2945_v6  ;;  %381 = vmatpush.bf16.msra.mxu2 %v2234_v24  ;;  %v2655_v31 = vld [vmem:[#allocation2 + $0xa0] sm:$0xf0]  ;;  %v2218_v32 = vor.u32 %v2653_v27, %v2215_v29  ;;  %v2201_v34 = vld [vmem:[#allocation2 + $0x78] sm:$0xf]  ;;  %vm123_vm7 = vcmp.ge.s32.totalorder %v3067_v3, 16 }
  0x1c   :  { %v128_v0 = vld [vmem:[%s3437_s25] sm:$0xff]  ;;  %v129_v1 = vld [vmem:[%s3437_s25 + $0x8] sm:$0xff]  ;;  %v2222_v33 = vor.u32 %v2655_v31, %v2221_v30  ;;  %v2650_v36 = vld [vmem:[#allocation2 + $0x7c] sm:$0xf]  ;;  %vm119_vm8 = vcmp.lt.s32.totalorder %v3067_v3, 16  ;;  %s3440_s1 = sld [smem:[#allocation13_spill]] }
  0x1d   :  { %132 = vadd.xlane.f32.xlu0 %v128_v0  ;;  %v2651_v35 = vld [vmem:[#allocation2 + $0x80] sm:$0xf0]  ;;  %v2203_v38 = vld [vmem:[#allocation2 + $0x84] sm:$0xf0]  ;;  %v2209_v39 = vld [vmem:[#allocation2 + $0x80] sm:$0xf] }
  0x1e   :  { %354 = vmatpush.bf16.msra.mxu0 %v2214_v28  ;;  %368 = vmatpush.bf16.msra.mxu1 %v2218_v32  ;;  %v2202_v37 = vor.u32 %v2651_v35, %v2201_v34  ;;  %v2652_v40 = vld [vmem:[#allocation2 + $0x88] sm:$0xf0]  ;;  %v2206_v41 = vor.u32 %v2650_v36, %v2203_v38  ;;  %v2189_v43 = vld [vmem:[#allocation2 + $0x60] sm:$0xf]  ;;  %v2647_v45 = vld [vmem:[#allocation2 + $0x64] sm:$0xf] }
  0x1f   :  { %382 = vmatpush.bf16.msra.mxu2 %v2222_v33  ;;  %v2210_v42 = vor.u32 %v2652_v40, %v2209_v39  ;;  %v2648_v44 = vld [vmem:[#allocation2 + $0x68] sm:$0xf0]  ;;  %v2191_v47 = vld [vmem:[#allocation2 + $0x6c] sm:$0xf0]  ;;  %v2197_v48 = vld [vmem:[#allocation2 + $0x68] sm:$0xf] }
  0x20   :  { %v2190_v46 = vor.u32 %v2648_v44, %v2189_v43  ;;  %v2649_v49 = vld [vmem:[#allocation2 + $0x70] sm:$0xf0]  ;;  %v2194_v50 = vor.u32 %v2647_v45, %v2191_v47  ;;  %v2177_v52 = vld [vmem:[#allocation2 + $0x48] sm:$0xf]  ;;  %v2644_v54 = vld [vmem:[#allocation2 + $0x4c] sm:$0xf] }
  0x21   :  { %v2198_v51 = vor.u32 %v2649_v49, %v2197_v48  ;;  %v2645_v53 = vld [vmem:[#allocation2 + $0x50] sm:$0xf0]  ;;  %v2179_v56 = vld [vmem:[#allocation2 + $0x54] sm:$0xf0]  ;;  %v2185_v57 = vld [vmem:[#allocation2 + $0x50] sm:$0xf] }
  0x22   :  { %355 = vmatpush.bf16.msra.mxu0 %v2202_v37  ;;  %369 = vmatpush.bf16.msra.mxu1 %v2206_v41  ;;  %v2178_v55 = vor.u32 %v2645_v53, %v2177_v52  ;;  %v2646_v58 = vld [vmem:[#allocation2 + $0x58] sm:$0xf0]  ;;  %v2182_v59 = vor.u32 %v2644_v54, %v2179_v56  ;;  %v2165_v61 = vld [vmem:[#allocation2 + $0x30] sm:$0xf]  ;;  %v2641_v63 = vld [vmem:[#allocation2 + $0x34] sm:$0xf] }
  0x23   :  { %383 = vmatpush.bf16.msra.mxu2 %v2210_v42  ;;  %v2186_v60 = vor.u32 %v2646_v58, %v2185_v57  ;;  %v2642_v62 = vld [vmem:[#allocation2 + $0x38] sm:$0xf0]  ;;  %v2173_v2 = vld [vmem:[#allocation2 + $0x38] sm:$0xf]  ;;  %v2161_v16 = vld [vmem:[#allocation2 + $0x20] sm:$0xf] }
  0x24   :  { %v2640_v17 = vld [vmem:[#allocation2 + $0x28] sm:$0xf0]  ;;  %v2141_v20 = vld [vmem:[#allocation2] sm:$0xf]  ;;  %v2635_v22 = vld [vmem:[#allocation2 + $0x4] sm:$0xf] }
  0x25   :  { %134 = vadd.xlane.f32.xlu0 %v129_v1  ;;  %v2162_v19 = vor.u32 %v2640_v17, %v2161_v16  ;;  %v2636_v21 = vld [vmem:[#allocation2 + $0x8] sm:$0xf0]  ;;  %v2143_v25 = vld [vmem:[#allocation2 + $0xc] sm:$0xf0]  ;;  %v2149_v26 = vld [vmem:[#allocation2 + $0x8] sm:$0xf] }
  0x26   :  { %356 = vmatpush.bf16.msra.mxu0 %v2190_v46  ;;  %370 = vmatpush.bf16.msra.mxu1 %v2194_v50  ;;  %v2142_v24 = vor.u32 %v2636_v21, %v2141_v20  ;;  %v2637_v27 = vld [vmem:[#allocation2 + $0x10] sm:$0xf0]  ;;  %v2146_v29 = vor.u32 %v2635_v22, %v2143_v25  ;;  %v2756_v48 = vld [vmem:[%s3438_s27] ss:$0 sm:$0xff]  ;;  %vm124_vm9 = vmand %vm123_vm7, %vm115_vm0  ;;  %vm420_vm10 = vcmask 64512   ;;  %s2946_s20 = smov [#allocation8]  }
  0x27   :  { %384 = vmatpush.bf16.msra.mxu2 %v2198_v51  ;;  %v2150_v30 = vor.u32 %v2637_v27, %v2149_v26  ;;  %v2757_v53 = vld [vmem:[%s3439_s29] ss:$0 sm:$0xff]  ;;  %s3441_s27 = sld [smem:[#allocation17_spill]] }
  0x28   :  { %v3130_v16 = vld [vmem:[%s3440_s1] sm:$0x3] }
  0x2a   :  { %357 = vmatpush.bf16.msra.mxu0 %v2178_v55  ;;  %371 = vmatpush.bf16.msra.mxu1 %v2182_v59  ;;  %v3111_v59 = vsel %vm119_vm8, 1.0, %v2945_v6 }
  0x2b   :  { %385 = vmatpush.bf16.msra.mxu2 %v2186_v60  ;;  %v3114_v60 = vsel %vm124_vm9, 1.0, %v2945_v6 }
  0x90   :  { %v133_v4 = vpop.xlane.xlu0 %132 }
  0x91   :  { %v136_v5 = vmul.f32 0.03125, %v133_v4  ;;  %v2643_v4 = vld [vmem:[#allocation2 + $0x40] sm:$0xf0] }
  0x93   :  { %v138_v8 = vsub.f32 %v128_v0, %v136_v5  ;;  %v2166_v0 = vor.u32 %v2642_v62, %v2165_v61 }
  0x95   :  { %v3076_v9 = vmul.f32 %v3073_v7, %v138_v8  ;;  %v2174_v8 = vor.u32 %v2643_v4, %v2173_v2  ;;  %358 = vmatpush.bf16.msra.mxu0 %v2166_v0 }
  0x97   :  { %v142_v10 = vmul.f32 %v3076_v9, %v3076_v9  ;;  %386 = vmatpush.bf16.msra.mxu2 %v2174_v8 }
  0x98   :  { %v135_v11 = vpop.xlane.xlu0 %134 }
  0x99   :  { %v137_v12 = vmul.f32 0.03125, %v135_v11  ;;  %144 = vadd.xlane.f32.xlu1 %v142_v10  ;;  %v2153_v10 = vld [vmem:[#allocation2 + $0x18] sm:$0xf]  ;;  %v2639_v11 = vld [vmem:[#allocation2 + $0x20] sm:$0xf0] }
  0x9b   :  { %v139_v13 = vsub.f32 %v129_v1, %v137_v12  ;;  %v2167_v1 = vld [vmem:[#allocation2 + $0x3c] sm:$0xf0]  ;;  %v2638_v12 = vld [vmem:[#allocation2 + $0x1c] sm:$0xf]  ;;  %387 = vmatpush.bf16.msra.mxu2 %v2162_v19  ;;  %v3133_v19 = vperm.slane %v3130_v16, 0 }
  0x9c   :  { %v2170_v5 = vor.u32 %v2641_v63, %v2167_v1 }
  0x9d   :  { %v3081_v14 = vmul.f32 %v3073_v7, %v139_v13  ;;  %v2154_v13 = vor.u32 %v2639_v11, %v2153_v10 }
  0x9e   :  { %372 = vmatpush.bf16.msra.mxu1 %v2170_v5 }
  0x9f   :  { %v143_v15 = vmul.f32 %v3081_v14, %v3081_v14  ;;  %359 = vmatpush.bf16.msra.mxu0 %v2154_v13  ;;  %388 = vmatpush.bf16.msra.mxu2 %v2150_v30 }
  0xa1   :  { %146 = vadd.xlane.f32.xlu1 %v143_v15  ;;  %v2155_v15 = vld [vmem:[#allocation2 + $0x24] sm:$0xf0] }
  0xa2   :  { %v2158_v18 = vor.u32 %v2638_v12, %v2155_v15 }
  0xa3   :  { %360 = vmatpush.bf16.msra.mxu0 %v2142_v24 }
  0xa4   :  { %373 = vmatpush.bf16.msra.mxu1 %v2158_v18 }
  0xa8   :  { %374 = vmatpush.bf16.msra.mxu1 %v2146_v29 }
 0x10c   :  { %v145_v23 = vpop.xlane.xlu1 %144 }
 0x10d   :  { %v148_v28 = vmul.f32 0.03125, %v145_v23 }
 0x10f   :  { %v150_v31 = vadd.f32 1e-12, %v148_v28 }
 0x111   :  { %2774 = vrsqrt.f32 %v150_v31  ;;  %vm158_vm2 = vweird.f32 %v150_v31 }
 0x114   :  { %v147_v32 = vpop.xlane.xlu1 %146 }
 0x115   :  { %v149_v33 = vmul.f32 0.03125, %v147_v32 }
 0x117   :  { %v2775_v34 = vpop.eup %2774  ;;  %v151_v35 = vadd.f32 1e-12, %v149_v33 }
 0x118   :  { %v153_v36 = vmul.f32 %v2775_v34, %v150_v31  ;;  %vm159_vm1 = vweird.f32 %v2775_v34 }
 0x119   :  { %2776 = vrsqrt.f32 %v151_v35  ;;  %vm160_vm3 = vmor %vm158_vm2, %vm159_vm1  ;;  %vm168_vm5 = vweird.f32 %v151_v35 }
 0x11a   :  { %v154_v37 = vmul.f32 %v2775_v34, %v153_v36 }
 0x11c   :  { %v155_v38 = vmul.f32 0.5, %v154_v37 }
 0x11e   :  { %v156_v39 = vsub.f32 1.5, %v155_v38 }
 0x11f   :  { %v2777_v40 = vpop.eup %2776 }
 0x120   :  { %v157_v41 = vmul.f32 %v2775_v34, %v156_v39  ;;  %v163_v42 = vmul.f32 %v2777_v40, %v151_v35  ;;  %vm169_vm4 = vweird.f32 %v2777_v40 }
 0x121   :  { %vm170_vm6 = vmor %vm168_vm5, %vm169_vm4 }
 0x122   :  { %v164_v43 = vmul.f32 %v2777_v40, %v163_v42  ;;  %v161_v44 = vsel %vm160_vm3, %v2775_v34, %v157_v41 }
 0x123   :  { %v172_v47 = vmul.f32 %v161_v44, %v3076_v9 }
 0x124   :  { %v165_v45 = vmul.f32 0.5, %v164_v43 }
 0x125   :  { %v177_v52 = vmul.f32 %v2756_v48, %v172_v47 }
 0x126   :  { %v166_v46 = vsub.f32 1.5, %v165_v45 }
 0x127   :  { %v3093_v55 = vadd.f32 %v2757_v53, %v177_v52 }
 0x128   :  { %v167_v49 = vmul.f32 %v2777_v40, %v166_v46 }
 0x12a   :  { %v171_v50 = vsel %vm170_vm6, %v2777_v40, %v167_v49 }
 0x12b   :  { %v173_v51 = vmul.f32 %v171_v50, %v3081_v14  ;;  %v3103_v14 = vld [vmem:[%s3413_s5] sm:$0x7] }
 0x12c   :  { %v219_v57 = vperm.slane %v3103_v14, 0  ;;  %v220_v58 = vperm.slane %v3103_v14, 1  ;;  %v221_v2 = vperm.slane %v3103_v14, 2 }
 0x12d   :  { %v178_v54 = vmul.f32 %v2756_v48, %v173_v51 }
 0x12f   :  { %v3095_v56 = vadd.f32 %v2757_v53, %v178_v54 }
 0x131   :  { %v184_v9 = vpack.c.bf16 %v3095_v56, %v3093_v55 }
 0x133   :  { %361 = vmatmul.bf16.vlgmr.msra.gmra.mxu0 %v184_v9  ;;  %375 = vmatmul.bf16.vlgmr.msra.gmra.mxu1 %v184_v9 }
 0x134   :  { %389 = vmatmul.bf16.vlgmr.msra.gmra.mxu2 %v184_v9 }
 0x1b0   :  { %v362_v61 = vpop.f32.mrf.mxu0  ;;  %v376_v62 = vpop.f32.mrf.mxu1 }
 0x1b1   :  { %v363_v63 = vadd.f32 %v362_v61, %v219_v57  ;;  %v377_v0 = vadd.f32 %v376_v62, %v220_v58 }
 0x1b3   :  { %v395_v3 = vmul.f32 %v3111_v59, %v363_v63  ;;  %v445_v1 = vmul.f32 %v3114_v60, %v363_v63  ;;  %412 = vmatpush.xpose.msrb.mxu1 %v377_v0  ;;  %462 = vmatpush.xpose.msrb.mxu2 %v377_v0 }
 0x1b6   :  { %413 = vmatmul.f32.vlgmr.msrb.gmra.mxu1 %v395_v3  ;;  %463 = vmatmul.f32.vlgmr.msrb.gmra.mxu2 %v445_v1 }
 0x1b7   :  { %v390_v6 = vpop.f32.mrf.mxu2 }
 0x1b8   :  { %v391_v4 = vadd.f32 %v390_v6, %v221_v2  ;;  %v378_v15 = vpop.f32.mrf.mxu1  ;;  %v364_v1 = vpop.f32.mrf.mxu0 }
 0x1b9   :  { %v379_v52 = vadd.f32 %v378_v15, %v220_v58  ;;  %v365_v58 = vadd.f32 %v364_v1, %v219_v57 }
 0x1ba   :  { %v446_v5 = vmul.f32 %v3114_v60, %v391_v4  ;;  %v396_v8 = vmul.f32 %v3111_v59, %v391_v4 }
 0x1bb   :  { %v588_v6 = vmul.f32 %v3114_v60, %v365_v58 }
 0x1bc   :  { %511 = vmatpush.msra.mxu3 %v446_v5 }
 0x1be   :  { %534 = vmatpush.msrb.mxu3 %v396_v8 }
 0x1bf   :  { %v392_v10 = vpop.f32.mrf.mxu2 }
 0x1c0   :  { %v393_v11 = vadd.f32 %v392_v10, %v221_v2  ;;  %v539_v2 = vmul.f32 %v3111_v59, %v365_v58  ;;  %v3152_v10 = vperm.slane %v3130_v16, 1 }
 0x1c2   :  { %v540_v12 = vmul.f32 %v3111_v59, %v393_v11  ;;  %v589_v13 = vmul.f32 %v3114_v60, %v393_v11 }
 0x1c4   :  { %654 = vmatpush.msrb.mxu0 %v589_v13  ;;  %677 = vmatpush.msra.mxu1 %v540_v12 }
 0x233   :  { %v414_v20 = vpop.f32.mrf.mxu1 }
 0x234   :  { %v417_v22 = vmul.f32 0.25, %v414_v20 }
 0x236   :  { %v419_v24 = vadd.f32 %v3133_v19, %v417_v22 }
 0x238   :  { %v421_v25 = vsel %vm420_vm10, %v419_v24, -inf }
 0x239   :  { %v464_v17 = vpop.f32.mrf.mxu2 }
 0x23a   :  { %v467_v18 = vmul.f32 0.25, %v464_v17 }
 0x23c   :  { %v468_v21 = vadd.f32 %v467_v18, %v3133_v19 }
 0x23e   :  { %v469_v23 = vsel %vm420_vm10, %v468_v21, -inf }
 0x23f   :  { %470 = vmax.xlane.f32.xlu2 %v469_v23 }
 0x247   :  { %422 = vmax.xlane.f32.xlu2 %v421_v25 }
 0x2b2   :  { %v471_v26 = vpop.xlane.xlu2 %470 }
 0x2b3   :  { %v472_v27 = vsub.f32 %v468_v21, %v471_v26 }
 0x2b5   :  { %v473_v28 = vmul.f32 1.442695, %v472_v27 }
 0x2b7   :  { %2778 = vpow2.f32 %v473_v28 }
 0x2ba   :  { %v423_v29 = vpop.xlane.xlu2 %422 }
 0x2bb   :  { %v424_v30 = vsub.f32 %v419_v24, %v423_v29  ;;  %v2666_v29 = vld [vmem:[%s3414_s6 + $0x38] sm:$0xff] }
 0x2bc   :  { %751 = vmatpush.bf16.msra.mxu2 %v2666_v29  ;;  %v2668_v29 = vld [vmem:[%s3418_s10 + $0x8] sm:$0xff] }
 0x2bd   :  { %v2779_v31 = vpop.eup %2778  ;;  %v425_v32 = vmul.f32 1.442695, %v424_v30  ;;  %v2665_v30 = vld [vmem:[%s3414_s6 + $0x30] sm:$0xff] }
 0x2be   :  { %v475_v33 = vsel %vm420_vm10, %v2779_v31, 0.0 }
 0x2bf   :  { %2780 = vpow2.f32 %v425_v32  ;;  %476 = vadd.xlane.f32.xlu0 %v475_v33  ;;  %v2664_v32 = vld [vmem:[%s3414_s6 + $0x28] sm:$0xff]  ;;  %v2663_v33 = vld [vmem:[%s3414_s6 + $0x20] sm:$0xff] }
 0x2c0   :  { %752 = vmatpush.bf16.msra.mxu2 %v2665_v30 }
 0x2c4   :  { %753 = vmatpush.bf16.msra.mxu2 %v2664_v32  ;;  %v2667_v32 = vld [vmem:[%s3418_s10] sm:$0xff] }
 0x2c5   :  { %v2781_v34 = vpop.eup %2780 }
 0x2c6   :  { %v427_v35 = vsel %vm420_vm10, %v2781_v34, 0.0 }
 0x2c7   :  { %428 = vadd.xlane.f32.xlu1 %v427_v35 }
 0x2c8   :  { %754 = vmatpush.bf16.msra.mxu2 %v2663_v33 }
 0x332   :  { %v477_v36 = vpop.xlane.xlu0 %476 }
 0x333   :  { %2782 = vrcp.f32 %v477_v36  ;;  %v489_v41 = vand.u32 2147483648, %v477_v36  ;;  %v487_v43 = vand.u32 2147483647, %v477_v36  ;;  %vm483_vm12 = vweird.f32 %v477_v36 }
 0x335   :  { %v490_v46 = vor.u32 1.1754944e-38, %v489_v41  ;;  %vm488_vm14 = vcmp.eq.f32.partialorder %v487_v43, 8.507059e+37 }
 0x339   :  { %v2783_v37 = vpop.eup %2782 }
 0x33a   :  { %v479_v38 = vmul.f32 %v2783_v37, %v477_v36  ;;  %v429_v39 = vpop.xlane.xlu1 %428  ;;  %vm484_vm11 = vweird.f32 %v2783_v37 }
 0x33b   :  { %2784 = vrcp.f32 %v429_v39  ;;  %vm485_vm13 = vmor %vm483_vm12, %vm484_vm11  ;;  %v441_v53 = vand.u32 2147483648, %v429_v39  ;;  %v439_v9 = vand.u32 2147483647, %v429_v39  ;;  %vm435_vm0 = vweird.f32 %v429_v39 }
 0x33c   :  { %v480_v40 = vsub.f32 1.0, %v479_v38  ;;  %v2662_v38 = vld [vmem:[%s3414_s6 + $0x18] sm:$0xff] }
 0x33d   :  { %v442_v62 = vor.u32 1.1754944e-38, %v441_v53  ;;  %vm440_vm2 = vcmp.eq.f32.partialorder %v439_v9, 8.507059e+37  ;;  %755 = vmatpush.bf16.msra.mxu2 %v2662_v38 }
 0x33e   :  { %v481_v42 = vmul.f32 %v2783_v37, %v480_v40 }
 0x340   :  { %v482_v44 = vadd.f32 %v2783_v37, %v481_v42 }
 0x341   :  { %v2785_v45 = vpop.eup %2784 }
 0x342   :  { %v431_v47 = vmul.f32 %v2785_v45, %v429_v39  ;;  %v486_v48 = vsel %vm485_vm13, %v2783_v37, %v482_v44  ;;  %vm436_vm15 = vweird.f32 %v2785_v45 }
 0x343   :  { %v491_v49 = vsel %vm488_vm14, %v490_v46, %v486_v48  ;;  %vm437_vm1 = vmor %vm435_vm0, %vm436_vm15 }
 0x344   :  { %v432_v50 = vsub.f32 1.0, %v431_v47  ;;  %v492_v51 = vmul.f32 %v2779_v31, %v491_v49 }
 0x346   :  { %v433_v54 = vmul.f32 %v2785_v45, %v432_v50  ;;  %2235 = vmatmul.msk.f32.vlgmr.msra.gmra.mxu3 %vm420_vm10, %v492_v51 }
 0x347   :  { %556 = vmatpush.xpose.msra.mxu3 %v379_v52 }
 0x348   :  { %v434_v61 = vadd.f32 %v2785_v45, %v433_v54 }
 0x34a   :  { %v438_v63 = vsel %vm437_vm1, %v2785_v45, %v434_v61 }
 0x34b   :  { %v443_v0 = vsel %vm440_vm2, %v442_v62, %v438_v63  ;;  %v2661_v63 = vld [vmem:[%s3414_s6 + $0x10] sm:$0xff] }
 0x34c   :  { %v444_v3 = vmul.f32 %v2781_v34, %v443_v0  ;;  %756 = vmatpush.bf16.msra.mxu2 %v2661_v63  ;;  %v2660_v0 = vld [vmem:[%s3414_s6 + $0x8] sm:$0xff] }
 0x34e   :  { %2236 = vmatmul.msk.f32.vlgmr.msrb.gmra.mxu3 %vm420_vm10, %v444_v3  ;;  %v2659_v3 = vld [vmem:[%s3414_s6] sm:$0xff] }
 0x34f   :  { %605 = vmatpush.xpose.msrb.mxu3 %v379_v52 }
 0x350   :  { %757 = vmatpush.bf16.msra.mxu2 %v2660_v0 }
 0x354   :  { %758 = vmatpush.bf16.msra.mxu2 %v2659_v3  ;;  %v2682_v3 = vld [vmem:[#allocation5 + $0x38] sm:$0xff] }
 0x355   :  { %991 = vmatpush.bf16.msra.mxu0 %v2682_v3  ;;  %v2702_v3 = vld [vmem:[#allocation2 + $0x158] sm:$0xf0] }
 0x356   :  { %557 = vmatmul.f32.vlgmr.msra.gmra.mxu3 %v539_v2 }
 0x35e   :  { %606 = vmatmul.f32.vlgmr.msrb.gmra.mxu3 %v588_v6 }
 0x3c9   :  { %v513_v4 = vpop.f32.mrf.mxu3 }
 0x3d1   :  { %v536_v5 = vpop.f32.mrf.mxu3 }
 0x3d2   :  { %v3149_v8 = vadd.f32 %v536_v5, %v513_v4  ;;  %v2758_v4 = vld [vmem:[%s3415_s7] ss:$0 sm:$0xff] }
 0x3d9   :  { %v558_v11 = vpop.f32.mrf.mxu3 }
 0x3da   :  { %v561_v12 = vmul.f32 0.25, %v558_v11 }
 0x3dc   :  { %v563_v13 = vadd.f32 %v3152_v10, %v561_v12 }
 0x3de   :  { %v564_v14 = vsel %vm420_vm10, %v563_v13, -inf }
 0x3df   :  { %565 = vmax.xlane.f32.xlu2 %v564_v14 }
 0x3e1   :  { %v607_v57 = vpop.f32.mrf.mxu3 }
 0x3e2   :  { %v610_v15 = vmul.f32 0.25, %v607_v57 }
 0x3e4   :  { %v611_v17 = vadd.f32 %v610_v15, %v3152_v10 }
 0x3e6   :  { %v612_v18 = vsel %vm420_vm10, %v611_v17, -inf }
 0x3e7   :  { %613 = vmax.xlane.f32.xlu0 %v612_v18 }
 0x452   :  { %v566_v20 = vpop.xlane.xlu2 %565 }
 0x453   :  { %v567_v21 = vsub.f32 %v563_v13, %v566_v20 }
 0x455   :  { %v568_v22 = vmul.f32 1.442695, %v567_v21 }
 0x457   :  { %2786 = vpow2.f32 %v568_v22 }
 0x45a   :  { %v614_v16 = vpop.xlane.xlu0 %613 }
 0x45b   :  { %v615_v23 = vsub.f32 %v611_v17, %v614_v16 }
 0x45d   :  { %v2787_v24 = vpop.eup %2786  ;;  %v616_v25 = vmul.f32 1.442695, %v615_v23 }
 0x45e   :  { %v570_v26 = vsel %vm420_vm10, %v2787_v24, 0.0 }
 0x45f   :  { %2788 = vpow2.f32 %v616_v25  ;;  %571 = vadd.xlane.f32.xlu1 %v570_v26  ;;  %v2672_v25 = vld [vmem:[%s3418_s10 + $0x28] sm:$0xff]  ;;  %v2671_v26 = vld [vmem:[%s3418_s10 + $0x20] sm:$0xff] }
 0x465   :  { %v2789_v27 = vpop.eup %2788 }
 0x466   :  { %v618_v28 = vsel %vm420_vm10, %v2789_v27, 0.0 }
 0x467   :  { %619 = vadd.xlane.f32.xlu2 %v618_v28  ;;  %v2669_v28 = vld [vmem:[%s3418_s10 + $0x10] sm:$0xff] }
 0x4d2   :  { %v572_v31 = vpop.xlane.xlu1 %571 }
 0x4d3   :  { %2790 = vrcp.f32 %v572_v31  ;;  %v584_v39 = vand.u32 2147483648, %v572_v31  ;;  %v582_v41 = vand.u32 2147483647, %v572_v31  ;;  %vm578_vm4 = vweird.f32 %v572_v31 }
 0x4d5   :  { %v585_v44 = vor.u32 1.1754944e-38, %v584_v39  ;;  %vm583_vm6 = vcmp.eq.f32.partialorder %v582_v41, 8.507059e+37 }
 0x4d9   :  { %v2791_v34 = vpop.eup %2790 }
 0x4da   :  { %v574_v35 = vmul.f32 %v2791_v34, %v572_v31  ;;  %v620_v36 = vpop.xlane.xlu2 %619  ;;  %vm579_vm3 = vweird.f32 %v2791_v34 }
 0x4db   :  { %2792 = vrcp.f32 %v620_v36  ;;  %vm580_vm5 = vmor %vm578_vm4, %vm579_vm3  ;;  %v632_v50 = vand.u32 2147483648, %v620_v36  ;;  %v630_v52 = vand.u32 2147483647, %v620_v36  ;;  %vm626_vm8 = vweird.f32 %v620_v36 }
 0x4dc   :  { %v575_v37 = vsub.f32 1.0, %v574_v35 }
 0x4dd   :  { %v633_v54 = vor.u32 1.1754944e-38, %v632_v50  ;;  %vm631_vm11 = vcmp.eq.f32.partialorder %v630_v52, 8.507059e+37  ;;  %v2759_v50 = vld [vmem:[%s3416_s8] ss:$0 sm:$0xff] }
 0x4de   :  { %v576_v40 = vmul.f32 %v2791_v34, %v575_v37 }
 0x4e0   :  { %v577_v42 = vadd.f32 %v2791_v34, %v576_v40 }
 0x4e1   :  { %v2793_v43 = vpop.eup %2792 }
 0x4e2   :  { %v581_v45 = vsel %vm580_vm5, %v2791_v34, %v577_v42  ;;  %v622_v46 = vmul.f32 %v2793_v43, %v620_v36  ;;  %vm627_vm7 = vweird.f32 %v2793_v43 }
 0x4e3   :  { %v586_v47 = vsel %vm583_vm6, %v585_v44, %v581_v45  ;;  %vm628_vm9 = vmor %vm626_vm8, %vm627_vm7 }
 0x4e4   :  { %v623_v48 = vsub.f32 1.0, %v622_v46  ;;  %v587_v49 = vmul.f32 %v2787_v24, %v586_v47 }
 0x4e6   :  { %v624_v51 = vmul.f32 %v2793_v43, %v623_v48  ;;  %2238 = vmatmul.msk.f32.vlgmr.msra.gmra.mxu1 %vm420_vm10, %v587_v49 }
 0x4e8   :  { %v625_v53 = vadd.f32 %v2793_v43, %v624_v51 }
 0x4ea   :  { %v629_v9 = vsel %vm628_vm9, %v2793_v43, %v625_v53 }
 0x4eb   :  { %v634_v61 = vsel %vm631_vm11, %v633_v54, %v629_v9  ;;  %v2760_v9 = vld [vmem:[%s3417_s9] ss:$0 sm:$0xff] }
 0x4ec   :  { %v635_v62 = vmul.f32 %v2789_v27, %v634_v61  ;;  %v2670_v27 = vld [vmem:[%s3418_s10 + $0x18] sm:$0xff] }
 0x4ee   :  { %2237 = vmatmul.msk.f32.vlgmr.msrb.gmra.mxu0 %vm420_vm10, %v635_v62 }
 0x563   :  { %v679_v1 = vpop.f32.mrf.mxu1 }
 0x56b   :  { %v656_v58 = vpop.f32.mrf.mxu0 }
 0x56c   :  { %v680_v2 = vadd.f32 %v679_v1, %v656_v58  ;;  %v2681_v1 = vld [vmem:[#allocation5 + $0x30] sm:$0xff]  ;;  %v2680_v58 = vld [vmem:[#allocation5 + $0x28] sm:$0xff] }
 0x56d   :  { %992 = vmatpush.bf16.msra.mxu0 %v2681_v1  ;;  %v2701_v1 = vld [vmem:[#allocation2 + $0x154] sm:$0xf] }
 0x56e   :  { %v682_v6 = vpack.c.bf16 %v680_v2, %v3149_v8  ;;  %v2679_v2 = vld [vmem:[#allocation5 + $0x20] sm:$0xff] }
 0x570   :  { %759 = vmatmul.bf16.vlgmr.msra.gmra.mxu2 %v682_v6  ;;  %v2678_v6 = vld [vmem:[#allocation5 + $0x18] sm:$0xff] }
 0x571   :  { %993 = vmatpush.bf16.msra.mxu0 %v2680_v58 }
 0x575   :  { %994 = vmatpush.bf16.msra.mxu0 %v2679_v2  ;;  %v2412_v2 = vld [vmem:[#allocation2 + $0x15c] sm:$0xf0] }
 0x579   :  { %995 = vmatpush.bf16.msra.mxu0 %v2678_v6  ;;  %v2418_v6 = vld [vmem:[#allocation2 + $0x158] sm:$0xf] }
 0x5f3   :  { %v760_v5 = vpop.f32.mrf.mxu2 }
 0x5f4   :  { %v761_v11 = vadd.f32 %v2758_v4, %v760_v5  ;;  %v2676_v5 = vld [vmem:[#allocation5 + $0x8] sm:$0xff] }
 0x5f6   :  { %v765_v12 = vadd.f32 %v761_v11, %v3093_v55  ;;  %v2674_v55 = vld [vmem:[%s3418_s10 + $0x38] sm:$0xff]  ;;  %v2675_v11 = vld [vmem:[#allocation5] sm:$0xff] }
 0x5f7   :  { %890 = vmatpush.bf16.msra.mxu3 %v2674_v55 }
 0x5f8   :  { %769 = vadd.xlane.f32.xlu0 %v765_v12 }
 0x5fb   :  { %v762_v13 = vpop.f32.mrf.mxu2 }
 0x5fc   :  { %v763_v14 = vadd.f32 %v2758_v4, %v762_v13  ;;  %v2677_v4 = vld [vmem:[#allocation5 + $0x10] sm:$0xff] }
 0x5fd   :  { %996 = vmatpush.bf16.msra.mxu0 %v2677_v4  ;;  %v2703_v4 = vld [vmem:[#allocation2 + $0x160] sm:$0xf0] }
 0x5fe   :  { %v766_v57 = vadd.f32 %v763_v14, %v3095_v56  ;;  %v2673_v56 = vld [vmem:[%s3418_s10 + $0x30] sm:$0xff] }
 0x5ff   :  { %891 = vmatpush.bf16.msra.mxu3 %v2673_v56 }
 0x600   :  { %771 = vadd.xlane.f32.xlu1 %v766_v57 }
 0x601   :  { %997 = vmatpush.bf16.msra.mxu0 %v2676_v5  ;;  %v2415_v5 = vor.u32 %v2701_v1, %v2412_v2  ;;  %v2346_v2 = vld [vmem:[#allocation2 + $0xc8] sm:$0xf] }
 0x603   :  { %892 = vmatpush.bf16.msra.mxu3 %v2672_v25 }
 0x605   :  { %998 = vmatpush.bf16.msra.mxu0 %v2675_v11  ;;  %v2419_v11 = vor.u32 %v2703_v4, %v2418_v6  ;;  %v2685_v4 = vld [vmem:[#allocation2 + $0xd0] sm:$0xf0] }
 0x607   :  { %893 = vmatpush.bf16.msra.mxu3 %v2671_v26 }
 0x60b   :  { %894 = vmatpush.bf16.msra.mxu3 %v2670_v27 }
 0x60f   :  { %895 = vmatpush.bf16.msra.mxu3 %v2669_v28 }
 0x613   :  { %896 = vmatpush.bf16.msra.mxu3 %v2668_v29 }
 0x617   :  { %897 = vmatpush.bf16.msra.mxu3 %v2667_v32 }
 0x66b   :  { %v770_v15 = vpop.xlane.xlu0 %769 }
 0x66c   :  { %v773_v17 = vmul.f32 0.03125, %v770_v15 }
 0x66e   :  { %v775_v18 = vsub.f32 %v765_v12, %v773_v17  ;;  %v2761_v12 = vld [vmem:[%s3419_s11] ss:$0 sm:$0xff] }
 0x670   :  { %v777_v8 = vmul.f32 %v3073_v7, %v775_v18 }
 0x672   :  { %v779_v20 = vmul.f32 %v777_v8, %v777_v8 }
 0x673   :  { %v772_v21 = vpop.xlane.xlu1 %771 }
 0x674   :  { %v774_v22 = vmul.f32 0.03125, %v772_v21  ;;  %781 = vadd.xlane.f32.xlu2 %v779_v20 }
 0x676   :  { %v776_v16 = vsub.f32 %v766_v57, %v774_v22 }
 0x678   :  { %v778_v23 = vmul.f32 %v3073_v7, %v776_v16 }
 0x67a   :  { %v780_v24 = vmul.f32 %v778_v23, %v778_v23 }
 0x67c   :  { %783 = vadd.xlane.f32.xlu0 %v780_v24 }
 0x6e7   :  { %v782_v30 = vpop.xlane.xlu2 %781 }
 0x6e8   :  { %v785_v31 = vmul.f32 0.03125, %v782_v30 }
 0x6ea   :  { %v787_v33 = vadd.f32 1e-12, %v785_v31 }
 0x6ec   :  { %2794 = vrsqrt.f32 %v787_v33  ;;  %vm795_vm13 = vweird.f32 %v787_v33 }
 0x6ef   :  { %v784_v34 = vpop.xlane.xlu0 %783 }
 0x6f0   :  { %v786_v35 = vmul.f32 0.03125, %v784_v34 }
 0x6f2   :  { %v2795_v36 = vpop.eup %2794  ;;  %v788_v37 = vadd.f32 1e-12, %v786_v35 }
 0x6f3   :  { %v790_v38 = vmul.f32 %v2795_v36, %v787_v33  ;;  %vm796_vm12 = vweird.f32 %v2795_v36  ;;  %v2762_v33 = vld [vmem:[%s3421_s13] ss:$0 sm:$0xff] }
 0x6f4   :  { %2796 = vrsqrt.f32 %v788_v37  ;;  %vm797_vm14 = vmor %vm795_vm13, %vm796_vm12  ;;  %vm805_vm0 = vweird.f32 %v788_v37 }
 0x6f5   :  { %v791_v39 = vmul.f32 %v2795_v36, %v790_v38 }
 0x6f7   :  { %v792_v40 = vmul.f32 0.5, %v791_v39 }
 0x6f9   :  { %v793_v41 = vsub.f32 1.5, %v792_v40 }
 0x6fa   :  { %v2797_v42 = vpop.eup %2796 }
 0x6fb   :  { %v794_v43 = vmul.f32 %v2795_v36, %v793_v41  ;;  %v800_v44 = vmul.f32 %v2797_v42, %v788_v37  ;;  %vm806_vm15 = vweird.f32 %v2797_v42 }
 0x6fc   :  { %vm807_vm1 = vmor %vm805_vm0, %vm806_vm15 }
 0x6fd   :  { %v801_v45 = vmul.f32 %v2797_v42, %v800_v44  ;;  %v798_v46 = vsel %vm797_vm14, %v2795_v36, %v794_v43 }
 0x6fe   :  { %v809_v49 = vmul.f32 %v798_v46, %v777_v8 }
 0x6ff   :  { %v802_v47 = vmul.f32 0.5, %v801_v45 }
 0x700   :  { %v814_v54 = vmul.f32 %v2759_v50, %v809_v49 }
 0x701   :  { %v803_v48 = vsub.f32 1.5, %v802_v47 }
 0x702   :  { %v819_v62 = vadd.f32 %v2760_v9, %v814_v54  ;;  %v2424_v54 = vld [vmem:[#allocation2 + $0x174] sm:$0xf0] }
 0x703   :  { %v804_v51 = vmul.f32 %v2797_v42, %v803_v48 }
 0x705   :  { %v808_v52 = vsel %vm807_vm1, %v2797_v42, %v804_v51  ;;  %v2705_v51 = vld [vmem:[#allocation2 + $0x170] sm:$0xf0] }
 0x706   :  { %v810_v53 = vmul.f32 %v808_v52, %v778_v23  ;;  %v2704_v52 = vld [vmem:[#allocation2 + $0x16c] sm:$0xf] }
 0x708   :  { %v815_v61 = vmul.f32 %v2759_v50, %v810_v53  ;;  %v2422_v50 = vld [vmem:[#allocation2 + $0x168] sm:$0xf] }
 0x709   :  { %v2423_v53 = vor.u32 %v2705_v51, %v2422_v50  ;;  %v2352_v51 = vld [vmem:[#allocation2 + $0xe4] sm:$0xf0] }
 0x70a   :  { %v820_v63 = vadd.f32 %v2760_v9, %v815_v61  ;;  %v2430_v9 = vld [vmem:[#allocation2 + $0x170] sm:$0xf]  ;;  %v2706_v61 = vld [vmem:[#allocation2 + $0x178] sm:$0xf0] }
 0x70b   :  { %1232 = vmatpush.bf16.msrb.mxu1 %v2423_v53  ;;  %v2688_v53 = vld [vmem:[#allocation2 + $0xe8] sm:$0xf0] }
 0x70c   :  { %v821_v0 = vpack.c.bf16 %v820_v63, %v819_v62 }
 0x70e   :  { %898 = vmatmul.bf16.vlgmr.msra.gmra.mxu3 %v821_v0  ;;  %v2410_v0 = vld [vmem:[#allocation2 + $0x150] sm:$0xf] }
 0x70f   :  { %v2411_v58 = vor.u32 %v2702_v3, %v2410_v0  ;;  %v2683_v0 = vld [vmem:[#allocation2 + $0xc4] sm:$0xf] }
 0x711   :  { %1233 = vmatpush.bf16.msrb.mxu1 %v2411_v58  ;;  %v2340_v58 = vld [vmem:[#allocation2 + $0xcc] sm:$0xf0] }
 0x712   :  { %v2343_v6 = vor.u32 %v2683_v0, %v2340_v58 }
 0x791   :  { %v899_v13 = vpop.f32.mrf.mxu3 }
 0x792   :  { %v900_v14 = vadd.f32 %v2761_v12, %v899_v13  ;;  %v2699_v13 = vld [vmem:[#allocation2 + $0x140] sm:$0xf0] }
 0x794   :  { %v906_v57 = vmul.f32 0.044715, %v900_v14  ;;  %v904_v27 = vmul.f32 0.5, %v900_v14 }
 0x796   :  { %v908_v15 = vmul.f32 %v906_v57, %v900_v14 }
 0x798   :  { %v910_v17 = vmul.f32 %v908_v15, %v900_v14  ;;  %v2400_v15 = vld [vmem:[#allocation2 + $0x144] sm:$0xf0] }
 0x799   :  { %v901_v18 = vpop.f32.mrf.mxu3 }
 0x79a   :  { %v912_v8 = vadd.f32 %v910_v17, %v900_v14  ;;  %v902_v20 = vadd.f32 %v2761_v12, %v901_v18  ;;  %v2398_v12 = vld [vmem:[#allocation2 + $0x138] sm:$0xf]  ;;  %v2698_v14 = vld [vmem:[#allocation2 + $0x13c] sm:$0xf]  ;;  %v2406_v17 = vld [vmem:[#allocation2 + $0x140] sm:$0xf] }
 0x79b   :  { %v2399_v57 = vor.u32 %v2699_v13, %v2398_v12  ;;  %v2700_v18 = vld [vmem:[#allocation2 + $0x148] sm:$0xf0] }
 0x79c   :  { %v907_v21 = vmul.f32 0.044715, %v902_v20  ;;  %v914_v22 = vmul.f32 0.7978846, %v912_v8  ;;  %v905_v28 = vmul.f32 0.5, %v902_v20  ;;  %v2403_v8 = vor.u32 %v2698_v14, %v2400_v15 }
 0x79d   :  { %1234 = vmatpush.bf16.msrb.mxu1 %v2399_v57 }
 0x79e   :  { %v909_v16 = vmul.f32 %v907_v21, %v902_v20  ;;  %2798 = vtanh.f32 %v914_v22  ;;  %v2386_v21 = vld [vmem:[#allocation2 + $0x120] sm:$0xf]  ;;  %v2696_v22 = vld [vmem:[#allocation2 + $0x128] sm:$0xf0] }
 0x7a0   :  { %v911_v23 = vmul.f32 %v909_v16, %v902_v20  ;;  %v2695_v16 = vld [vmem:[#allocation2 + $0x124] sm:$0xf] }
 0x7a2   :  { %v913_v24 = vadd.f32 %v911_v23, %v902_v20  ;;  %v2407_v20 = vor.u32 %v2700_v18, %v2406_v17  ;;  %v2387_v23 = vor.u32 %v2696_v22, %v2386_v21 }
 0x7a4   :  { %v915_v55 = vmul.f32 0.7978846, %v913_v24  ;;  %v2799_v56 = vpop.eup %2798  ;;  %v2388_v24 = vld [vmem:[#allocation2 + $0x12c] sm:$0xf0]  ;;  %1235 = vmatpush.bf16.msrb.mxu1 %v2387_v23 }
 0x7a5   :  { %v918_v25 = vadd.f32 1.0, %v2799_v56  ;;  %v2697_v56 = vld [vmem:[#allocation2 + $0x130] sm:$0xf0] }
 0x7a6   :  { %2800 = vtanh.f32 %v915_v55  ;;  %v2394_v55 = vld [vmem:[#allocation2 + $0x128] sm:$0xf] }
 0x7a7   :  { %v920_v30 = vmul.f32 %v918_v25, %v904_v27  ;;  %v2391_v25 = vor.u32 %v2695_v16, %v2388_v24  ;;  %v2374_v27 = vld [vmem:[#allocation2 + $0x108] sm:$0xf] }
 0x7ac   :  { %v2801_v26 = vpop.eup %2800 }
 0x7ad   :  { %v919_v29 = vadd.f32 1.0, %v2801_v26  ;;  %v2395_v26 = vor.u32 %v2697_v56, %v2394_v55 }
 0x7af   :  { %v921_v31 = vmul.f32 %v919_v29, %v905_v28  ;;  %v2693_v28 = vld [vmem:[#allocation2 + $0x110] sm:$0xf0]  ;;  %v2692_v29 = vld [vmem:[#allocation2 + $0x10c] sm:$0xf] }
 0x7b1   :  { %v922_v32 = vpack.c.bf16 %v921_v31, %v920_v30  ;;  %v2375_v30 = vor.u32 %v2693_v28, %v2374_v27  ;;  %v2376_v31 = vld [vmem:[#allocation2 + $0x114] sm:$0xf0] }
 0x7b3   :  { %999 = vmatmul.bf16.vlgmr.msra.gmra.mxu0 %v922_v32  ;;  %v2382_v32 = vld [vmem:[#allocation2 + $0x110] sm:$0xf]  ;;  %1236 = vmatpush.bf16.msrb.mxu1 %v2375_v30  ;;  %v2764_v30 = vld [vmem:[%s3423_s15] ss:$0 sm:$0xff] }
 0x830   :  { %v1000_v34 = vpop.f32.mrf.mxu0 }
 0x831   :  { %v1001_v35 = vadd.f32 %v2762_v33, %v1000_v34  ;;  %v2379_v34 = vor.u32 %v2692_v29, %v2376_v31 }
 0x833   :  { %v1005_v36 = vadd.f32 %v1001_v35, %v819_v62  ;;  %v2427_v62 = vor.u32 %v2704_v52, %v2424_v54  ;;  %v2358_v52 = vld [vmem:[#allocation2 + $0xe0] sm:$0xf] }
 0x835   :  { %1009 = vadd.xlane.f32.xlu1 %v1005_v36  ;;  %1246 = vmatpush.bf16.msrb.mxu2 %v2427_v62  ;;  %v2338_v62 = vld [vmem:[#allocation2 + $0xc0] sm:$0xf] }
 0x838   :  { %v1002_v37 = vpop.f32.mrf.mxu0 }
 0x839   :  { %v1003_v38 = vadd.f32 %v2762_v33, %v1002_v37  ;;  %1247 = vmatpush.bf16.msrb.mxu2 %v2415_v5  ;;  %v2694_v33 = vld [vmem:[#allocation2 + $0x118] sm:$0xf0] }
 0x83a   :  { %v2383_v35 = vor.u32 %v2694_v33, %v2382_v32  ;;  %v2690_v37 = vld [vmem:[#allocation2 + $0xf8] sm:$0xf0] }
 0x83b   :  { %v1006_v39 = vadd.f32 %v1003_v38, %v820_v63  ;;  %v2431_v63 = vor.u32 %v2706_v61, %v2430_v9  ;;  %v2689_v38 = vld [vmem:[#allocation2 + $0xf4] sm:$0xf]  ;;  %v2359_v61 = vor.u32 %v2688_v53, %v2358_v52 }
 0x83d   :  { %1011 = vadd.xlane.f32.xlu2 %v1006_v39  ;;  %1260 = vmatpush.bf16.msrb.mxu3 %v2431_v63  ;;  %v2684_v63 = vld [vmem:[#allocation2 + $0xc8] sm:$0xf0] }
 0x83e   :  { %1248 = vmatpush.bf16.msrb.mxu2 %v2403_v8  ;;  %v2339_v1 = vor.u32 %v2684_v63, %v2338_v62 }
 0x841   :  { %1261 = vmatpush.bf16.msrb.mxu3 %v2419_v11  ;;  %v2347_v11 = vor.u32 %v2685_v4, %v2346_v2 }
 0x842   :  { %1249 = vmatpush.bf16.msrb.mxu2 %v2391_v25  ;;  %v2763_v25 = vld [vmem:[%s3422_s14] ss:$0 sm:$0xff] }
 0x845   :  { %1262 = vmatpush.bf16.msrb.mxu3 %v2407_v20 }
 0x846   :  { %1250 = vmatpush.bf16.msrb.mxu2 %v2379_v34 }
 0x849   :  { %1263 = vmatpush.bf16.msrb.mxu3 %v2395_v26 }
 0x84d   :  { %1264 = vmatpush.bf16.msrb.mxu3 %v2383_v35 }
 0x8a8   :  { %v1010_v40 = vpop.xlane.xlu1 %1009 }
 0x8a9   :  { %v1013_v41 = vmul.f32 0.03125, %v1010_v40  ;;  %v2364_v40 = vld [vmem:[#allocation2 + $0xfc] sm:$0xf0] }
 0x8ab   :  { %v1015_v42 = vsub.f32 %v1005_v36, %v1013_v41  ;;  %v2362_v36 = vld [vmem:[#allocation2 + $0xf0] sm:$0xf]  ;;  %v2370_v41 = vld [vmem:[#allocation2 + $0xf8] sm:$0xf] }
 0x8ad   :  { %v3231_v43 = vmul.f32 %v3073_v7, %v1015_v42  ;;  %v2691_v42 = vld [vmem:[#allocation2 + $0x100] sm:$0xf0] }
 0x8af   :  { %v1019_v44 = vmul.f32 %v3231_v43, %v3231_v43 }
 0x8b0   :  { %v1012_v45 = vpop.xlane.xlu2 %1011 }
 0x8b1   :  { %v1014_v46 = vmul.f32 0.03125, %v1012_v45  ;;  %1021 = vadd.xlane.f32.xlu0 %v1019_v44  ;;  %v2367_v44 = vor.u32 %v2689_v38, %v2364_v40  ;;  %v2371_v45 = vor.u32 %v2691_v42, %v2370_v41 }
 0x8b3   :  { %v1016_v47 = vsub.f32 %v1006_v39, %v1014_v46  ;;  %v2363_v39 = vor.u32 %v2690_v37, %v2362_v36  ;;  %1251 = vmatpush.bf16.msrb.mxu2 %v2367_v44  ;;  %1265 = vmatpush.bf16.msrb.mxu3 %v2371_v45  ;;  %v2350_v46 = vld [vmem:[#allocation2 + $0xd8] sm:$0xf] }
 0x8b5   :  { %v3236_v48 = vmul.f32 %v3073_v7, %v1016_v47  ;;  %1237 = vmatpush.bf16.msrb.mxu1 %v2363_v39  ;;  %v2687_v47 = vld [vmem:[#allocation2 + $0xe0] sm:$0xf0] }
 0x8b6   :  { %v2351_v50 = vor.u32 %v2687_v47, %v2350_v46 }
 0x8b7   :  { %v1020_v49 = vmul.f32 %v3236_v48, %v3236_v48  ;;  %1266 = vmatpush.bf16.msrb.mxu3 %v2359_v61 }
 0x8b9   :  { %1023 = vadd.xlane.f32.xlu1 %v1020_v49  ;;  %v2686_v49 = vld [vmem:[#allocation2 + $0xdc] sm:$0xf]  ;;  %1238 = vmatpush.bf16.msrb.mxu1 %v2351_v50 }
 0x8ba   :  { %v2355_v9 = vor.u32 %v2686_v49, %v2352_v51 }
 0x8bb   :  { %1267 = vmatpush.bf16.msrb.mxu3 %v2347_v11 }
 0x8bc   :  { %1252 = vmatpush.bf16.msrb.mxu2 %v2355_v9 }
 0x8bd   :  { %1239 = vmatpush.bf16.msrb.mxu1 %v2339_v1 }
 0x8c0   :  { %1253 = vmatpush.bf16.msrb.mxu2 %v2343_v6 }
 0x924   :  { %v1022_v54 = vpop.xlane.xlu0 %1021 }
 0x925   :  { %v1025_v3 = vmul.f32 0.03125, %v1022_v54 }
 0x927   :  { %v1027_v5 = vadd.f32 1e-12, %v1025_v3 }
 0x929   :  { %2802 = vrsqrt.f32 %v1027_v5  ;;  %vm1035_vm3 = vweird.f32 %v1027_v5 }
 0x92c   :  { %v1024_v12 = vpop.xlane.xlu1 %1023 }
 0x92d   :  { %v1026_v13 = vmul.f32 0.03125, %v1024_v12 }
 0x92f   :  { %v2803_v14 = vpop.eup %2802  ;;  %v1028_v57 = vadd.f32 1e-12, %v1026_v13 }
 0x930   :  { %v1030_v15 = vmul.f32 %v2803_v14, %v1027_v5  ;;  %vm1036_vm2 = vweird.f32 %v2803_v14 }
 0x931   :  { %2804 = vrsqrt.f32 %v1028_v57  ;;  %vm1037_vm4 = vmor %vm1035_vm3, %vm1036_vm2  ;;  %vm1045_vm6 = vweird.f32 %v1028_v57 }
 0x932   :  { %v1031_v17 = vmul.f32 %v2803_v14, %v1030_v15 }
 0x934   :  { %v1032_v18 = vmul.f32 0.5, %v1031_v17 }
 0x936   :  { %v1033_v8 = vsub.f32 1.5, %v1032_v18 }
 0x937   :  { %v2805_v20 = vpop.eup %2804 }
 0x938   :  { %v1034_v21 = vmul.f32 %v2803_v14, %v1033_v8  ;;  %v1040_v22 = vmul.f32 %v2805_v20, %v1028_v57  ;;  %vm1046_vm5 = vweird.f32 %v2805_v20 }
 0x939   :  { %vm1047_vm7 = vmor %vm1045_vm6, %vm1046_vm5 }
 0x93a   :  { %v1041_v16 = vmul.f32 %v2805_v20, %v1040_v22  ;;  %v1038_v23 = vsel %vm1037_vm4, %v2803_v14, %v1034_v21 }
 0x93b   :  { %v1049_v56 = vmul.f32 %v1038_v23, %v3231_v43 }
 0x93c   :  { %v1042_v24 = vmul.f32 0.5, %v1041_v16 }
 0x93d   :  { %v1054_v29 = vmul.f32 %v2763_v25, %v1049_v56 }
 0x93e   :  { %v1043_v55 = vsub.f32 1.5, %v1042_v24 }
 0x93f   :  { %v3248_v32 = vadd.f32 %v2764_v30, %v1054_v29 }
 0x940   :  { %v1044_v26 = vmul.f32 %v2805_v20, %v1043_v55 }
 0x942   :  { %v1048_v27 = vsel %vm1047_vm7, %v2805_v20, %v1044_v26 }
 0x943   :  { %v1050_v28 = vmul.f32 %v1048_v27, %v3236_v48  ;;  %v3257_v48 = vld [vmem:[%s3413_s5 + $0x3] sm:$0x7] }
 0x944   :  { %v1098_v34 = vperm.slane %v3257_v48, 0  ;;  %v1099_v35 = vperm.slane %v3257_v48, 1  ;;  %v1100_v37 = vperm.slane %v3257_v48, 2 }
 0x945   :  { %v1055_v31 = vmul.f32 %v2763_v25, %v1050_v28 }
 0x947   :  { %v3250_v33 = vadd.f32 %v2764_v30, %v1055_v31 }
 0x949   :  { %v1061_v43 = vpack.c.bf16 %v3250_v33, %v3248_v32 }
 0x94b   :  { %1240 = vmatmul.bf16.vlgmr.msrb.gmra.mxu1 %v1061_v43  ;;  %1254 = vmatmul.bf16.vlgmr.msrb.gmra.mxu2 %v1061_v43 }
 0x94c   :  { %1268 = vmatmul.bf16.vlgmr.msrb.gmra.mxu3 %v1061_v43 }
 0x9c8   :  { %v1241_v36 = vpop.f32.mrf.mxu1 }
 0x9c9   :  { %v1242_v39 = vadd.f32 %v1241_v36, %v1098_v34 }
 0x9cb   :  { %v1274_v46 = vmul.f32 %v3111_v59, %v1242_v39  ;;  %v1322_v47 = vmul.f32 %v3114_v60, %v1242_v39 }
 0x9ce   :  { %v1255_v38 = vpop.f32.mrf.mxu2 }
 0x9cf   :  { %v1256_v40 = vadd.f32 %v1255_v38, %v1099_v35  ;;  %v1269_v41 = vpop.f32.mrf.mxu3 }
 0x9d0   :  { %v1270_v42 = vadd.f32 %v1269_v41, %v1100_v37  ;;  %v3272_v54 = vpop.f32.mrf.mxu1 }
 0x9d1   :  { %1291 = vmatpush.xpose.msrb.mxu0 %v1256_v40  ;;  %1339 = vmatpush.xpose.msra.mxu1 %v1256_v40  ;;  %v1244_v40 = vadd.f32 %v3272_v54, %v1098_v34 }
 0x9d2   :  { %v1275_v44 = vmul.f32 %v3111_v59, %v1270_v42  ;;  %v1323_v45 = vmul.f32 %v3114_v60, %v1270_v42 }
 0x9d3   :  { %v1416_v41 = vmul.f32 %v3111_v59, %v1244_v40  ;;  %v1464_v42 = vmul.f32 %v3114_v60, %v1244_v40 }
 0x9d4   :  { %1292 = vmatmul.f32.vlgmr.msrb.gmra.mxu0 %v1274_v46  ;;  %1340 = vmatmul.f32.vlgmr.msra.gmra.mxu1 %v1322_v47 }
 0x9d5   :  { %1388 = vmatpush.msra.mxu0 %v1323_v45  ;;  %1411 = vmatpush.msrb.mxu1 %v1275_v44 }
 0x9d6   :  { %v1257_v49 = vpop.f32.mrf.mxu2 }
 0x9d7   :  { %v1258_v50 = vadd.f32 %v1257_v49, %v1099_v35  ;;  %v1271_v51 = vpop.f32.mrf.mxu3 }
 0x9d8   :  { %v3268_v52 = vadd.f32 %v1271_v51, %v1100_v37 }
 0x9d9   :  { %1433 = vmatpush.xpose.msrb.mxu0 %v1258_v50  ;;  %1481 = vmatpush.xpose.msra.mxu1 %v1258_v50 }
 0x9da   :  { %v1465_v53 = vmul.f32 %v3114_v60, %v3268_v52  ;;  %v1417_v38 = vmul.f32 %v3111_v59, %v3268_v52 }
 0x9dc   :  { %1530 = vmatpush.msra.mxu2 %v1465_v53 }
 0xa51   :  { %v1293_v9 = vpop.f32.mrf.mxu0  ;;  %v1341_v61 = vpop.f32.mrf.mxu1 }
 0xa52   :  { %v1296_v62 = vmul.f32 0.25, %v1293_v9  ;;  %v1344_v63 = vmul.f32 0.25, %v1341_v61 }
 0xa54   :  { %v1345_v0 = vadd.f32 %v1344_v63, %v3133_v19  ;;  %v1297_v3 = vadd.f32 %v1296_v62, %v3133_v19 }
 0xa56   :  { %v1346_v1 = vsel %vm420_vm10, %v1345_v0, -inf  ;;  %v1298_v58 = vsel %vm420_vm10, %v1297_v3, -inf }
 0xa57   :  { %1347 = vmax.xlane.f32.xlu0 %v1346_v1  ;;  %1299 = vmax.xlane.f32.xlu2 %v1298_v58  ;;  %v2714_v1 = vld [vmem:[%s3414_s6 + $0x78] sm:$0xff]  ;;  %v2713_v58 = vld [vmem:[%s3414_s6 + $0x70] sm:$0xff] }
 0xa58   :  { %1629 = vmatpush.bf16.msra.mxu3 %v2714_v1 }
 0xa5c   :  { %1630 = vmatpush.bf16.msra.mxu3 %v2713_v58 }
 0xaca   :  { %v1348_v2 = vpop.xlane.xlu0 %1347  ;;  %v1300_v6 = vpop.xlane.xlu2 %1299 }
 0xacb   :  { %v1349_v4 = vsub.f32 %v1345_v0, %v1348_v2  ;;  %v1301_v5 = vsub.f32 %v1297_v3, %v1300_v6  ;;  %v2712_v2 = vld [vmem:[%s3414_s6 + $0x68] sm:$0xff]  ;;  %v2711_v6 = vld [vmem:[%s3414_s6 + $0x60] sm:$0xff] }
 0xacc   :  { %1631 = vmatpush.bf16.msra.mxu3 %v2712_v2 }
 0xacd   :  { %v1350_v11 = vmul.f32 1.442695, %v1349_v4  ;;  %v1302_v12 = vmul.f32 1.442695, %v1301_v5 }
 0xacf   :  { %2806 = vpow2.f32 %v1350_v11  ;;  %v2710_v11 = vld [vmem:[%s3414_s6 + $0x58] sm:$0xff] }
 0xad0   :  { %2808 = vpow2.f32 %v1302_v12  ;;  %1632 = vmatpush.bf16.msra.mxu3 %v2711_v6 }
 0xad4   :  { %1633 = vmatpush.bf16.msra.mxu3 %v2710_v11 }
 0xad5   :  { %v2807_v13 = vpop.eup %2806 }
 0xad6   :  { %v2809_v14 = vpop.eup %2808  ;;  %v1352_v57 = vsel %vm420_vm10, %v2807_v13, 0.0 }
 0xad7   :  { %1353 = vadd.xlane.f32.xlu2 %v1352_v57  ;;  %v1304_v19 = vsel %vm420_vm10, %v2809_v14, 0.0 }
 0xad8   :  { %1305 = vadd.xlane.f32.xlu1 %v1304_v19 }
 0xb4a   :  { %v1354_v15 = vpop.xlane.xlu2 %1353 }
 0xb4b   :  { %v1306_v17 = vpop.xlane.xlu1 %1305  ;;  %2810 = vrcp.f32 %v1354_v15  ;;  %v1366_v23 = vand.u32 2147483648, %v1354_v15  ;;  %v1364_v56 = vand.u32 2147483647, %v1354_v15  ;;  %vm1360_vm11 = vweird.f32 %v1354_v15 }
 0xb4c   :  { %2812 = vrcp.f32 %v1306_v17  ;;  %v1318_v24 = vand.u32 2147483648, %v1306_v17  ;;  %v1316_v26 = vand.u32 2147483647, %v1306_v17  ;;  %vm1312_vm12 = vweird.f32 %v1306_v17 }
 0xb4d   :  { %v1367_v29 = vor.u32 1.1754944e-38, %v1366_v23  ;;  %vm1365_vm15 = vcmp.eq.f32.partialorder %v1364_v56, 8.507059e+37 }
 0xb4e   :  { %v1319_v30 = vor.u32 1.1754944e-38, %v1318_v24  ;;  %vm1317_vm0 = vcmp.eq.f32.partialorder %v1316_v26, 8.507059e+37 }
 0xb51   :  { %v2811_v18 = vpop.eup %2810 }
 0xb52   :  { %v2813_v8 = vpop.eup %2812  ;;  %v1356_v20 = vmul.f32 %v2811_v18, %v1354_v15  ;;  %vm1361_vm8 = vweird.f32 %v2811_v18 }
 0xb53   :  { %v1308_v21 = vmul.f32 %v2813_v8, %v1306_v17  ;;  %vm1313_vm9 = vweird.f32 %v2813_v8  ;;  %vm1362_vm13 = vmor %vm1360_vm11, %vm1361_vm8 }
 0xb54   :  { %v1357_v22 = vsub.f32 1.0, %v1356_v20  ;;  %vm1314_vm14 = vmor %vm1312_vm12, %vm1313_vm9 }
 0xb55   :  { %v1309_v16 = vsub.f32 1.0, %v1308_v21 }
 0xb56   :  { %v1358_v55 = vmul.f32 %v2811_v18, %v1357_v22 }
 0xb57   :  { %v1310_v25 = vmul.f32 %v2813_v8, %v1309_v16 }
 0xb58   :  { %v1359_v27 = vadd.f32 %v2811_v18, %v1358_v55 }
 0xb59   :  { %v1311_v28 = vadd.f32 %v2813_v8, %v1310_v25 }
 0xb5a   :  { %v1363_v31 = vsel %vm1362_vm13, %v2811_v18, %v1359_v27 }
 0xb5b   :  { %v1315_v43 = vsel %vm1314_vm14, %v2813_v8, %v1311_v28  ;;  %v1368_v35 = vsel %vm1365_vm15, %v1367_v29, %v1363_v31  ;;  %v2708_v31 = vld [vmem:[%s3414_s6 + $0x48] sm:$0xff] }
 0xb5c   :  { %v1320_v36 = vsel %vm1317_vm0, %v1319_v30, %v1315_v43  ;;  %v1369_v37 = vmul.f32 %v2807_v13, %v1368_v35  ;;  %v2709_v30 = vld [vmem:[%s3414_s6 + $0x50] sm:$0xff]  ;;  %v2707_v43 = vld [vmem:[%s3414_s6 + $0x40] sm:$0xff] }
 0xb5d   :  { %v1321_v39 = vmul.f32 %v2809_v14, %v1320_v36  ;;  %1634 = vmatpush.bf16.msra.mxu3 %v2709_v30  ;;  %v2728_v30 = vld [vmem:[#allocation5 + $0x68] sm:$0xff] }
 0xb5e   :  { %2432 = vmatmul.msk.f32.vlgmr.msra.gmra.mxu0 %vm420_vm10, %v1369_v37 }
 0xb5f   :  { %2433 = vmatmul.msk.f32.vlgmr.msrb.gmra.mxu1 %vm420_vm10, %v1321_v39  ;;  %1553 = vmatpush.msra.mxu0 %v1417_v38  ;;  %v2765_v39 = vld [vmem:[%s3415_s7 + $0x1] ss:$0 sm:$0xff] }
 0xb61   :  { %1635 = vmatpush.bf16.msra.mxu3 %v2708_v31  ;;  %v2727_v31 = vld [vmem:[#allocation5 + $0x60] sm:$0xff] }
 0xb65   :  { %1636 = vmatpush.bf16.msra.mxu3 %v2707_v43  ;;  %v2726_v43 = vld [vmem:[#allocation5 + $0x58] sm:$0xff] }
 0xb66   :  { %1434 = vmatmul.f32.vlgmr.msrb.gmra.mxu0 %v1416_v41 }
 0xb67   :  { %1482 = vmatmul.f32.vlgmr.msra.gmra.mxu1 %v1464_v42 }
 0xbdb   :  { %v1390_v44 = vpop.f32.mrf.mxu0 }
 0xbdc   :  { %v1413_v45 = vpop.f32.mrf.mxu1 }
 0xbdd   :  { %v3289_v46 = vadd.f32 %v1413_v45, %v1390_v44 }
 0xbe3   :  { %v1435_v47 = vpop.f32.mrf.mxu0 }
 0xbe4   :  { %v1438_v49 = vmul.f32 0.25, %v1435_v47  ;;  %v1483_v50 = vpop.f32.mrf.mxu1 }
 0xbe5   :  { %v1486_v51 = vmul.f32 0.25, %v1483_v50 }
 0xbe6   :  { %v1439_v52 = vadd.f32 %v1438_v49, %v3152_v10 }
 0xbe7   :  { %v1487_v48 = vadd.f32 %v1486_v51, %v3152_v10 }
 0xbe8   :  { %v1440_v34 = vsel %vm420_vm10, %v1439_v52, -inf }
 0xbe9   :  { %v1488_v59 = vsel %vm420_vm10, %v1487_v48, -inf  ;;  %1441 = vmax.xlane.f32.xlu1 %v1440_v34 }
 0xbea   :  { %1489 = vmax.xlane.f32.xlu0 %v1488_v59 }
 0xc5c   :  { %v1442_v60 = vpop.xlane.xlu1 %1441 }
 0xc5d   :  { %v1490_v53 = vpop.xlane.xlu0 %1489  ;;  %v1443_v54 = vsub.f32 %v1439_v52, %v1442_v60 }
 0xc5e   :  { %v1491_v9 = vsub.f32 %v1487_v48, %v1490_v53 }
 0xc5f   :  { %v1444_v61 = vmul.f32 1.442695, %v1443_v54  ;;  %v2720_v54 = vld [vmem:[%s3418_s10 + $0x68] sm:$0xff] }
 0xc60   :  { %v1492_v62 = vmul.f32 1.442695, %v1491_v9  ;;  %v2719_v9 = vld [vmem:[%s3418_s10 + $0x60] sm:$0xff] }
 0xc61   :  { %2814 = vpow2.f32 %v1444_v61  ;;  %v2718_v61 = vld [vmem:[%s3418_s10 + $0x58] sm:$0xff] }
 0xc62   :  { %2816 = vpow2.f32 %v1492_v62  ;;  %v2717_v62 = vld [vmem:[%s3418_s10 + $0x50] sm:$0xff] }
 0xc67   :  { %v2815_v63 = vpop.eup %2814 }
 0xc68   :  { %v2817_v0 = vpop.eup %2816  ;;  %v1446_v3 = vsel %vm420_vm10, %v2815_v63, 0.0 }
 0xc69   :  { %v1494_v10 = vsel %vm420_vm10, %v2817_v0, 0.0  ;;  %1447 = vadd.xlane.f32.xlu0 %v1446_v3  ;;  %v2715_v3 = vld [vmem:[%s3418_s10 + $0x40] sm:$0xff] }
 0xc6a   :  { %1495 = vadd.xlane.f32.xlu2 %v1494_v10 }
 0xcdc   :  { %v1448_v4 = vpop.xlane.xlu0 %1447 }
 0xcdd   :  { %2818 = vrcp.f32 %v1448_v4  ;;  %v1496_v5 = vpop.xlane.xlu2 %1495  ;;  %v1460_v15 = vand.u32 2147483648, %v1448_v4  ;;  %v1458_v8 = vand.u32 2147483647, %v1448_v4  ;;  %vm1454_vm3 = vweird.f32 %v1448_v4 }
 0xcde   :  { %2820 = vrcp.f32 %v1496_v5  ;;  %v1508_v20 = vand.u32 2147483648, %v1496_v5  ;;  %v1506_v22 = vand.u32 2147483647, %v1496_v5  ;;  %vm1502_vm5 = vweird.f32 %v1496_v5 }
 0xcdf   :  { %v1461_v23 = vor.u32 1.1754944e-38, %v1460_v15  ;;  %vm1459_vm6 = vcmp.eq.f32.partialorder %v1458_v8, 8.507059e+37 }
 0xce0   :  { %v1509_v56 = vor.u32 1.1754944e-38, %v1508_v20  ;;  %vm1507_vm8 = vcmp.eq.f32.partialorder %v1506_v22, 8.507059e+37 }
 0xce3   :  { %v2819_v12 = vpop.eup %2818 }
 0xce4   :  { %v2821_v13 = vpop.eup %2820  ;;  %v1450_v14 = vmul.f32 %v2819_v12, %v1448_v4  ;;  %vm1455_vm1 = vweird.f32 %v2819_v12 }
 0xce5   :  { %v1498_v57 = vmul.f32 %v2821_v13, %v1496_v5  ;;  %vm1503_vm2 = vweird.f32 %v2821_v13  ;;  %vm1456_vm4 = vmor %vm1454_vm3, %vm1455_vm1 }
 0xce6   :  { %v1451_v19 = vsub.f32 1.0, %v1450_v14  ;;  %vm1504_vm7 = vmor %vm1502_vm5, %vm1503_vm2  ;;  %vm1950_vm5 = vcmask 1040384  }
 0xce7   :  { %v1499_v17 = vsub.f32 1.0, %v1498_v57 }
 0xce8   :  { %v1452_v18 = vmul.f32 %v2819_v12, %v1451_v19 }
 0xce9   :  { %v1500_v21 = vmul.f32 %v2821_v13, %v1499_v17 }
 0xcea   :  { %v1453_v16 = vadd.f32 %v2819_v12, %v1452_v18 }
 0xceb   :  { %v1501_v24 = vadd.f32 %v2821_v13, %v1500_v21  ;;  %v2766_v21 = vld [vmem:[%s3416_s8 + $0x1] ss:$0 sm:$0xff]  ;;  %s2123_s8 = sshll.u32 %s2946_s20, 4  ;;  %s2124_s8 = int_to_ptr.vmem [resolvable:$true] %s2123_s8 }
 0xcec   :  { %v1457_v55 = vsel %vm1456_vm4, %v2819_v12, %v1453_v16 }
 0xced   :  { %v1462_v25 = vsel %vm1459_vm6, %v1461_v23, %v1457_v55  ;;  %v1505_v26 = vsel %vm1504_vm7, %v2821_v13, %v1501_v24  ;;  %v2767_v55 = vld [vmem:[%s3417_s9 + $0x1] ss:$0 sm:$0xff] }
 0xcee   :  { %v1510_v27 = vsel %vm1507_vm8, %v1509_v56, %v1505_v26  ;;  %v1463_v28 = vmul.f32 %v2815_v63, %v1462_v25  ;;  %v2716_v63 = vld [vmem:[%s3418_s10 + $0x48] sm:$0xff] }
 0xcef   :  { %v1511_v29 = vmul.f32 %v2817_v0, %v1510_v27 }
 0xcf0   :  { %2435 = vmatmul.msk.f32.vlgmr.msra.gmra.mxu0 %vm420_vm10, %v1463_v28  ;;  %v2730_v28 = vld [vmem:[#allocation5 + $0x78] sm:$0xff] }
 0xcf1   :  { %2434 = vmatmul.msk.f32.vlgmr.msra.gmra.mxu2 %vm420_vm10, %v1511_v29  ;;  %v2729_v29 = vld [vmem:[#allocation5 + $0x70] sm:$0xff] }
 0xcf2   :  { %1875 = vmatpush.bf16.msrb.mxu2 %v2730_v28 }
 0xcf6   :  { %1876 = vmatpush.bf16.msrb.mxu2 %v2729_v29 }
 0xcfa   :  { %1877 = vmatpush.bf16.msrb.mxu2 %v2728_v30  ;;  %v2745_v30 = vld [vmem:[#allocation7 + $0x30] sm:$0xff] }
 0xcfe   :  { %1878 = vmatpush.bf16.msrb.mxu2 %v2727_v31 }
 0xd02   :  { %1879 = vmatpush.bf16.msrb.mxu2 %v2726_v43 }
 0xd6d   :  { %v1555_v35 = vpop.f32.mrf.mxu0 }
 0xd74   :  { %v1532_v36 = vpop.f32.mrf.mxu2 }
 0xd75   :  { %v1556_v37 = vadd.f32 %v1555_v35, %v1532_v36  ;;  %v2725_v35 = vld [vmem:[#allocation5 + $0x50] sm:$0xff]  ;;  %v2724_v36 = vld [vmem:[#allocation5 + $0x48] sm:$0xff] }
 0xd76   :  { %1880 = vmatpush.bf16.msrb.mxu2 %v2725_v35  ;;  %v2744_v35 = vld [vmem:[#allocation7 + $0x28] sm:$0xff] }
 0xd77   :  { %v1558_v38 = vpack.c.bf16 %v1556_v37, %v3289_v46  ;;  %v2723_v37 = vld [vmem:[#allocation5 + $0x40] sm:$0xff] }
 0xd79   :  { %1637 = vmatmul.bf16.vlgmr.msra.gmra.mxu3 %v1558_v38  ;;  %v2768_v38 = vld [vmem:[%s3419_s11 + $0x1] ss:$0 sm:$0xff] }
 0xd7a   :  { %1881 = vmatpush.bf16.msrb.mxu2 %v2724_v36 }
 0xd7e   :  { %1882 = vmatpush.bf16.msrb.mxu2 %v2723_v37 }
 0xdfc   :  { %v1638_v40 = vpop.f32.mrf.mxu3 }
 0xdfd   :  { %v1639_v41 = vadd.f32 %v2765_v39, %v1638_v40 }
 0xdff   :  { %v1643_v42 = vadd.f32 %v1639_v41, %v3248_v32  ;;  %v2722_v32 = vld [vmem:[%s3418_s10 + $0x78] sm:$0xff] }
 0xe00   :  { %1772 = vmatpush.bf16.msrb.mxu1 %v2722_v32 }
 0xe01   :  { %1649 = vadd.xlane.f32.xlu1 %v1643_v42 }
 0xe04   :  { %v1640_v44 = vpop.f32.mrf.mxu3 }
 0xe05   :  { %v1641_v45 = vadd.f32 %v2765_v39, %v1640_v44 }
 0xe07   :  { %v1644_v47 = vadd.f32 %v1641_v45, %v3250_v33  ;;  %v2721_v33 = vld [vmem:[%s3418_s10 + $0x70] sm:$0xff] }
 0xe08   :  { %1773 = vmatpush.bf16.msrb.mxu1 %v2721_v33 }
 0xe09   :  { %1651 = vadd.xlane.f32.xlu2 %v1644_v47 }
 0xe0c   :  { %1774 = vmatpush.bf16.msrb.mxu1 %v2720_v54 }
 0xe10   :  { %1775 = vmatpush.bf16.msrb.mxu1 %v2719_v9 }
 0xe14   :  { %1776 = vmatpush.bf16.msrb.mxu1 %v2718_v61 }
 0xe18   :  { %1777 = vmatpush.bf16.msrb.mxu1 %v2717_v62 }
 0xe1c   :  { %1778 = vmatpush.bf16.msrb.mxu1 %v2716_v63  ;;  %v2769_v63 = vld [vmem:[%s3421_s13 + $0x1] ss:$0 sm:$0xff]  ;;  %s2125_s13 = sshll.u32 %s3441_s27, 4  ;;  %s2126_s13 = int_to_ptr.hbm [resolvable:$true] %s2125_s13 }
 0xe20   :  { %1779 = vmatpush.bf16.msrb.mxu1 %v2715_v3 }
 0xe74   :  { %v1650_v49 = vpop.xlane.xlu1 %1649 }
 0xe75   :  { %v1653_v50 = vmul.f32 0.03125, %v1650_v49 }
 0xe77   :  { %v1655_v51 = vsub.f32 %v1643_v42, %v1653_v50 }
 0xe79   :  { %v1657_v46 = vmul.f32 %v3073_v7, %v1655_v51 }
 0xe7b   :  { %v1659_v52 = vmul.f32 %v1657_v46, %v1657_v46 }
 0xe7c   :  { %v1652_v48 = vpop.xlane.xlu2 %1651 }
 0xe7d   :  { %v1654_v34 = vmul.f32 0.03125, %v1652_v48  ;;  %1661 = vadd.xlane.f32.xlu0 %v1659_v52 }
 0xe7f   :  { %v1656_v59 = vsub.f32 %v1644_v47, %v1654_v34 }
 0xe81   :  { %v1658_v60 = vmul.f32 %v3073_v7, %v1656_v59 }
 0xe83   :  { %v1660_v53 = vmul.f32 %v1658_v60, %v1658_v60 }
 0xe85   :  { %1663 = vadd.xlane.f32.xlu1 %v1660_v53 }
 0xef0   :  { %v1662_v0 = vpop.xlane.xlu0 %1661 }
 0xef1   :  { %v1665_v10 = vmul.f32 0.03125, %v1662_v0 }
 0xef3   :  { %v1667_v1 = vadd.f32 1e-12, %v1665_v10 }
 0xef5   :  { %2822 = vrsqrt.f32 %v1667_v1  ;;  %vm1675_vm9 = vweird.f32 %v1667_v1 }
 0xef8   :  { %v1664_v58 = vpop.xlane.xlu1 %1663 }
 0xef9   :  { %v1666_v2 = vmul.f32 0.03125, %v1664_v58 }
 0xefb   :  { %v2823_v6 = vpop.eup %2822  ;;  %v1668_v4 = vadd.f32 1e-12, %v1666_v2 }
 0xefc   :  { %v1670_v5 = vmul.f32 %v2823_v6, %v1667_v1  ;;  %vm1676_vm10 = vweird.f32 %v2823_v6 }
 0xefd   :  { %2824 = vrsqrt.f32 %v1668_v4  ;;  %vm1677_vm11 = vmor %vm1675_vm9, %vm1676_vm10  ;;  %vm1685_vm13 = vweird.f32 %v1668_v4 }
 0xefe   :  { %v1671_v11 = vmul.f32 %v2823_v6, %v1670_v5 }
 0xf00   :  { %v1672_v12 = vmul.f32 0.5, %v1671_v11 }
 0xf02   :  { %v1673_v13 = vsub.f32 1.5, %v1672_v12 }
 0xf03   :  { %v2825_v14 = vpop.eup %2824 }
 0xf04   :  { %v1674_v57 = vmul.f32 %v2823_v6, %v1673_v13  ;;  %v1680_v19 = vmul.f32 %v2825_v14, %v1668_v4  ;;  %vm1686_vm12 = vweird.f32 %v2825_v14 }
 0xf05   :  { %vm1687_vm14 = vmor %vm1685_vm13, %vm1686_vm12 }
 0xf06   :  { %v1681_v15 = vmul.f32 %v2825_v14, %v1680_v19  ;;  %v1678_v17 = vsel %vm1677_vm11, %v2823_v6, %v1674_v57 }
 0xf07   :  { %v1689_v20 = vmul.f32 %v1678_v17, %v1657_v46  ;;  %v2738_v17 = vld [vmem:[%s3424_s16 + $0x38] sm:$0xff] }
 0xf08   :  { %v1682_v18 = vmul.f32 0.5, %v1681_v15  ;;  %2021 = vmatpush.bf16.msrb.mxu0 %v2738_v17 }
 0xf09   :  { %v1694_v24 = vmul.f32 %v2766_v21, %v1689_v20  ;;  %v2734_v20 = vld [vmem:[%s3424_s16 + $0x18] sm:$0xff] }
 0xf0a   :  { %v1683_v8 = vsub.f32 1.5, %v1682_v18  ;;  %v2737_v18 = vld [vmem:[%s3424_s16 + $0x30] sm:$0xff] }
 0xf0b   :  { %v1699_v25 = vadd.f32 %v2767_v55, %v1694_v24 }
 0xf0c   :  { %v1684_v22 = vmul.f32 %v2825_v14, %v1683_v8  ;;  %2022 = vmatpush.bf16.msrb.mxu0 %v2737_v18  ;;  %v2736_v8 = vld [vmem:[%s3424_s16 + $0x28] sm:$0xff] }
 0xf0e   :  { %v1688_v16 = vsel %vm1687_vm14, %v2825_v14, %v1684_v22 }
 0xf0f   :  { %v1690_v23 = vmul.f32 %v1688_v16, %v1658_v60 }
 0xf10   :  { %2023 = vmatpush.bf16.msrb.mxu0 %v2736_v8 }
 0xf11   :  { %v1695_v56 = vmul.f32 %v2766_v21, %v1690_v23  ;;  %v2733_v21 = vld [vmem:[%s3424_s16 + $0x10] sm:$0xff]  ;;  %v2732_v23 = vld [vmem:[%s3424_s16 + $0x8] sm:$0xff] }
 0xf13   :  { %v1700_v26 = vadd.f32 %v2767_v55, %v1695_v56  ;;  %v2731_v55 = vld [vmem:[%s3424_s16] sm:$0xff] }
 0xf15   :  { %v1701_v27 = vpack.c.bf16 %v1700_v26, %v1699_v25 }
 0xf17   :  { %1780 = vmatmul.bf16.vlgmr.msrb.gmra.mxu1 %v1701_v27 }
 0xf94   :  { %v1781_v39 = vpop.f32.mrf.mxu1 }
 0xf95   :  { %v1782_v40 = vadd.f32 %v2768_v38, %v1781_v39  ;;  %v2743_v39 = vld [vmem:[#allocation7 + $0x20] sm:$0xff] }
 0xf97   :  { %v1788_v41 = vmul.f32 0.044715, %v1782_v40  ;;  %v1786_v32 = vmul.f32 0.5, %v1782_v40 }
 0xf99   :  { %v1790_v42 = vmul.f32 %v1788_v41, %v1782_v40 }
 0xf9b   :  { %v1792_v44 = vmul.f32 %v1790_v42, %v1782_v40 }
 0xf9c   :  { %v1783_v45 = vpop.f32.mrf.mxu1 }
 0xf9d   :  { %v1794_v47 = vadd.f32 %v1792_v44, %v1782_v40  ;;  %v1784_v49 = vadd.f32 %v2768_v38, %v1783_v45  ;;  %v2742_v44 = vld [vmem:[#allocation7 + $0x18] sm:$0xff] }
 0xf9f   :  { %v1789_v50 = vmul.f32 0.044715, %v1784_v49  ;;  %v1796_v51 = vmul.f32 0.7978846, %v1794_v47  ;;  %v1787_v33 = vmul.f32 0.5, %v1784_v49 }
 0xfa1   :  { %v1791_v46 = vmul.f32 %v1789_v50, %v1784_v49  ;;  %2826 = vtanh.f32 %v1796_v51  ;;  %v2770_v50 = vld [vmem:[%s3422_s14 + $0x1] ss:$0 sm:$0xff] }
 0xfa3   :  { %v1793_v52 = vmul.f32 %v1791_v46, %v1784_v49 }
 0xfa5   :  { %v1795_v48 = vadd.f32 %v1793_v52, %v1784_v49 }
 0xfa7   :  { %v1797_v34 = vmul.f32 0.7978846, %v1795_v48  ;;  %v2827_v59 = vpop.eup %2826 }
 0xfa8   :  { %v1800_v60 = vadd.f32 1.0, %v2827_v59  ;;  %v2771_v59 = vld [vmem:[%s3423_s15 + $0x1] ss:$0 sm:$0xff] }
 0xfa9   :  { %2828 = vtanh.f32 %v1797_v34 }
 0xfaa   :  { %v1802_v9 = vmul.f32 %v1800_v60, %v1786_v32 }
 0xfaf   :  { %v2829_v53 = vpop.eup %2828 }
 0xfb0   :  { %v1801_v54 = vadd.f32 1.0, %v2829_v53 }
 0xfb2   :  { %v1803_v61 = vmul.f32 %v1801_v54, %v1787_v33 }
 0xfb4   :  { %v1804_v62 = vpack.c.bf16 %v1803_v61, %v1802_v9  ;;  %v2741_v9 = vld [vmem:[#allocation7 + $0x10] sm:$0xff]  ;;  %v2740_v61 = vld [vmem:[#allocation7 + $0x8] sm:$0xff] }
 0xfb6   :  { %1883 = vmatmul.bf16.vlgmr.msrb.gmra.mxu2 %v1804_v62  ;;  %v2739_v62 = vld [vmem:[#allocation7] sm:$0xff] }
0x1039   :  { %v1884_v0 = vpop.f32.mrf.mxu2 }
0x103a   :  { %v1885_v3 = vadd.f32 %v2769_v63, %v1884_v0 }
0x103c   :  { %v1889_v10 = vadd.f32 %v1885_v3, %v1699_v25 }
0x103e   :  { %1895 = vadd.xlane.f32.xlu0 %v1889_v10 }
0x1041   :  { %v1886_v1 = vpop.f32.mrf.mxu2 }
0x1042   :  { %v1887_v58 = vadd.f32 %v2769_v63, %v1886_v1  ;;  %v2772_v63 = vld [vmem:[%s3425_s17] ss:$0 sm:$0xff] }
0x1044   :  { %v1890_v2 = vadd.f32 %v1887_v58, %v1700_v26  ;;  %v2746_v26 = vld [vmem:[#allocation7 + $0x38] sm:$0xff] }
0x1045   :  { %2104 = vmatpush.bf16.msrb.mxu3 %v2746_v26 }
0x1046   :  { %1897 = vadd.xlane.f32.xlu2 %v1890_v2 }
0x1049   :  { %2105 = vmatpush.bf16.msrb.mxu3 %v2745_v30 }
0x104d   :  { %2106 = vmatpush.bf16.msrb.mxu3 %v2744_v35 }
0x1051   :  { %2107 = vmatpush.bf16.msrb.mxu3 %v2743_v39 }
0x1055   :  { %2108 = vmatpush.bf16.msrb.mxu3 %v2742_v44 }
0x1059   :  { %2109 = vmatpush.bf16.msrb.mxu3 %v2741_v9 }
0x105d   :  { %2110 = vmatpush.bf16.msrb.mxu3 %v2740_v61 }
0x1061   :  { %2111 = vmatpush.bf16.msrb.mxu3 %v2739_v62 }
0x10b1   :  { %v1896_v6 = vpop.xlane.xlu0 %1895 }
0x10b2   :  { %v1899_v4 = vmul.f32 0.03125, %v1896_v6 }
0x10b4   :  { %v1901_v5 = vsub.f32 %v1889_v10, %v1899_v4 }
0x10b6   :  { %v1903_v11 = vmul.f32 %v3073_v7, %v1901_v5 }
0x10b8   :  { %v1905_v12 = vmul.f32 %v1903_v11, %v1903_v11 }
0x10b9   :  { %v1898_v13 = vpop.xlane.xlu2 %1897 }
0x10ba   :  { %v1900_v14 = vmul.f32 0.03125, %v1898_v13  ;;  %1907 = vadd.xlane.f32.xlu2 %v1905_v12 }
0x10bc   :  { %v1902_v57 = vsub.f32 %v1890_v2, %v1900_v14  ;;  %v2773_v2 = vld [vmem:[%s3427_s19] ss:$0 sm:$0xff] }
0x10be   :  { %v1904_v19 = vmul.f32 %v3073_v7, %v1902_v57  ;;  %v2735_v7 = vld [vmem:[%s3424_s16 + $0x20] sm:$0xff] }
0x10bf   :  { %2024 = vmatpush.bf16.msrb.mxu0 %v2735_v7 }
0x10c0   :  { %v1906_v15 = vmul.f32 %v1904_v19, %v1904_v19 }
0x10c2   :  { %1909 = vadd.xlane.f32.xlu1 %v1906_v15 }
0x10c3   :  { %2025 = vmatpush.bf16.msrb.mxu0 %v2734_v20 }
0x10c7   :  { %2026 = vmatpush.bf16.msrb.mxu0 %v2733_v21 }
0x10cb   :  { %2027 = vmatpush.bf16.msrb.mxu0 %v2732_v23 }
0x10cf   :  { %2028 = vmatpush.bf16.msrb.mxu0 %v2731_v55 }
0x112d   :  { %v1908_v22 = vpop.xlane.xlu2 %1907 }
0x112e   :  { %v1911_v16 = vmul.f32 0.03125, %v1908_v22 }
0x1130   :  { %v1913_v24 = vadd.f32 1e-12, %v1911_v16 }
0x1132   :  { %2830 = vrsqrt.f32 %v1913_v24  ;;  %vm1921_vm0 = vweird.f32 %v1913_v24 }
0x1135   :  { %v1910_v56 = vpop.xlane.xlu1 %1909 }
0x1136   :  { %v1912_v25 = vmul.f32 0.03125, %v1910_v56 }
0x1138   :  { %v2831_v27 = vpop.eup %2830  ;;  %v1914_v28 = vadd.f32 1e-12, %v1912_v25 }
0x1139   :  { %v1916_v29 = vmul.f32 %v2831_v27, %v1913_v24  ;;  %vm1922_vm15 = vweird.f32 %v2831_v27 }
0x113a   :  { %2832 = vrsqrt.f32 %v1914_v28  ;;  %vm1923_vm1 = vmor %vm1921_vm0, %vm1922_vm15  ;;  %vm1931_vm3 = vweird.f32 %v1914_v28 }
0x113b   :  { %v1917_v31 = vmul.f32 %v2831_v27, %v1916_v29 }
0x113d   :  { %v1918_v43 = vmul.f32 0.5, %v1917_v31 }
0x113f   :  { %v1919_v36 = vsub.f32 1.5, %v1918_v43 }
0x1140   :  { %v2833_v37 = vpop.eup %2832 }
0x1141   :  { %v1926_v38 = vmul.f32 %v2833_v37, %v1914_v28  ;;  %v1920_v40 = vmul.f32 %v2831_v27, %v1919_v36  ;;  %vm1932_vm2 = vweird.f32 %v2833_v37 }
0x1142   :  { %vm1933_vm4 = vmor %vm1931_vm3, %vm1932_vm2 }
0x1143   :  { %v1927_v41 = vmul.f32 %v2833_v37, %v1926_v38  ;;  %v1924_v45 = vsel %vm1923_vm1, %v2831_v27, %v1920_v40 }
0x1144   :  { %v1935_v51 = vmul.f32 %v1924_v45, %v1903_v11 }
0x1145   :  { %v1928_v42 = vmul.f32 0.5, %v1927_v41 }
0x1146   :  { %v1940_v48 = vmul.f32 %v2770_v50, %v1935_v51 }
0x1147   :  { %v1929_v47 = vsub.f32 1.5, %v1928_v42 }
0x1148   :  { %v1945_v53 = vadd.f32 %v2771_v59, %v1940_v48 }
0x1149   :  { %v1930_v49 = vmul.f32 %v2833_v37, %v1929_v47 }
0x114b   :  { %v1934_v46 = vsel %vm1933_vm4, %v2833_v37, %v1930_v49 }
0x114c   :  { %v1936_v52 = vmul.f32 %v1934_v46, %v1904_v19 }
0x114e   :  { %v1941_v34 = vmul.f32 %v2770_v50, %v1936_v52 }
0x1150   :  { %v1946_v60 = vadd.f32 %v2771_v59, %v1941_v34 }
0x1152   :  { %v1948_v32 = vrot.slane %v1946_v60, 7 }
0x1154   :  { %v1951_v33 = vsel %vm1950_vm5, %v1945_v53, %v1948_v32 }
0x1155   :  { %v1952_v54 = vpack.c.bf16 %v1951_v33, %v1951_v33 }
0x1157   :  { %2029 = vmatmul.bf16.vlgmr.msrb.gmra.mxu0 %v1952_v54 }
0x11d4   :  { %v2030_v0 = vpop.f32.mrf.mxu0 }
0x11d5   :  { %v2031_v3 = vadd.f32 %v2772_v63, %v2030_v0 }
0x11d7   :  { %2834 = vtanh.f32 %v2031_v3 }
0x11dc   :  { %v2032_v10 = vpop.f32.mrf.mxu0 }
0x11dd   :  { %v2835_v1 = vpop.eup %2834 }
0x11de   :  { %v2035_v58 = vpack.c.bf16 %v2835_v1, %v2835_v1 }
0x11e0   :  { %2112 = vmatmul.bf16.vlgmr.msrb.gmra.mxu3 %v2035_v58 }
0x1263   :  { %v2113_v6 = vpop.f32.mrf.mxu3 }
0x1264   :  { %v2114_v4 = vadd.f32 %v2773_v2, %v2113_v6 }
0x1266   :  { %2117 = vst [vmem:[#allocation8] sm:$0x3] %v2114_v4 }
0x1267   :  { %2128 = dma.vmem_to_hbm [thread:$0]  %s2124_s8, 32, %s2126_s13, [#allocation4]  }
0x126b   :  { %v2115_v5 = vpop.f32.mrf.mxu3 }
0x126c   :  { %2936 = dma.done.wait [#allocation4], 32  }
0x126d   :  { %2937 = vsyncadd [#allocation4], 4294967264 }
0x126e   :  { %2133 = vsyncpa [#allocation3], 1 }
0x126f   :  { %2134 = vsyncpa [#allocation6], 1 }
0x1270   :  { %2135 = vsyncpa [#allocation4], 1 }

</bundles_post_ra>
